<compile_context>
chip_gen: v7x
topology: tpu7x:2x2x1
jax: 0.10.0
libtpu: 0.0.40
codegen_flags: <defaults>
</compile_context>

<pallas_src>
import functools

import jax
import jax.numpy as jnp
from jax.experimental import pallas as pl
from jax.experimental.pallas import tpu as pltpu

LANE = 128        # TPU lane width: feature dims and N are padded to multiples of this
DEF_T_DST = 256   # destination-node tile (rows per grid step)
NEG_FILL = -1e30  # mask fill for non-edges (exp underflows to 0 after row-max shift)


def _round_up(v, m):
    return (v + m - 1) // m * m


def gat_block_kernel(x_hbm, elog_ref, w_ref, attd_ref, atts_ref,
                     bias_ref, gamma_ref, beta_ref, sm_ref, o_ref,
                     xbuf, hbuf, asrc_buf, *, t_dst):
    """Fused GATBlock.  grid = (num_layers, num_dst_tiles)."""
    l = pl.program_id(0)
    t = pl.program_id(1)

    # x is read exactly once: manual copy HBM -> resident VMEM scratch, no
    # double-buffered BlockSpec stream for it.
    @pl.when(jnp.logical_and(l == 0, t == 0))
    def _():
        pltpu.sync_copy(x_hbm, xbuf)

    # Once per layer: project all nodes (h = x @ W) and the source-attention row.
    @pl.when(t == 0)
    def _():
        xb = xbuf[...].astype(jnp.bfloat16)
        h = jnp.dot(xb, w_ref[0], preferred_element_type=jnp.float32)   # [NP, FP]
        hb = h.astype(jnp.bfloat16)
        hbuf[...] = hb
        # a_src[s] = <h[s], att_src>, produced directly as a [1, NP] row
        # (no transpose / lane shuffle needed for the broadcast below).
        asrc_buf[...] = jax.lax.dot_general(
            atts_ref[0], hb, (((1,), (1,)), ((), ())),
            preferred_element_type=jnp.float32)

    r0 = pl.multiple_of(t * t_dst, t_dst)
    h_tile = hbuf[pl.ds(r0, t_dst), :]                                  # [T, FP] bf16

    # attention logits for this destination tile:
    #   logit[d, s] = <h[d], att_dst> + <h[s], att_src> + edge_logit[d, s]
    # The adjacency mask is already folded into elog (non-edges are -1e30),
    # so no extra compare/select pass is needed.
    a_dst = jnp.dot(h_tile, attd_ref[0],
                    preferred_element_type=jnp.float32)                 # [T, 1]
    logits = a_dst + asrc_buf[...] + elog_ref[0].astype(jnp.float32)    # [T, NP]
    logits = jnp.where(logits >= 0.0, logits, 0.2 * logits)             # LeakyReLU(0.2)

    # masked softmax over source nodes (== PyG per-destination segment softmax);
    # every row has a finite self-loop logit, so the row max is finite and the
    # masked entries underflow to exactly 0 after the max shift.
    m = jnp.max(logits, axis=-1, keepdims=True)
    p = jnp.exp(logits - m)                                             # [T, NP]
    denom = jnp.sum(p, axis=-1, keepdims=True)                          # [T, 1]

    # aggregate messages on the MXU with UNNORMALIZED weights, then normalize
    # the [T, FP] result (normalization commutes with the linear aggregation).
    agg = jnp.dot(p.astype(jnp.bfloat16), hbuf[...],
                  preferred_element_type=jnp.float32)                   # [T, FP]
    out = agg * pl.reciprocal(denom, approx=False) + bias_ref[0]

    # TODO(synk): config['non_linearity'] is a python callable in the original
    # module; fixed here to ReLU.
    out = jnp.maximum(out, 0.0)

    # LayerNorm over the *real* feature columns only (sm = mask / num_features).
    # Padded columns of `out` are exactly zero and gamma/beta are zero-padded,
    # so padded columns stay zero for the next layer.
    sm = sm_ref[0]
    mu = jnp.sum(out * sm, axis=-1, keepdims=True)
    d = out - mu
    var = jnp.sum(d * d * sm, axis=-1, keepdims=True)
    y = d * jax.lax.rsqrt(var + 1e-5) * gamma_ref[0] + beta_ref[0]

    o_ref[...] = y                         # written every layer; final layer wins
    xbuf[pl.ds(r0, t_dst), :] = y          # feeds layer l+1


def _gat_block_pallas(x_pad, elog, w, attd, atts, bias, gamma, beta, sm,
                      *, t_dst):
    L, NP, _ = elog.shape
    FP = w.shape[-1]
    T = min(t_dst, NP)
    if NP % T != 0:
        T = LANE
    assert NP % T == 0
    grid = (L, NP // T)

    args = (x_pad, elog, w, attd, atts, bias, gamma, beta, sm)
    flops = int(L * (2 * NP * FP * FP + 2 * NP * NP * FP + 4 * NP * FP + 12 * NP * NP))
    bytes_accessed = int(sum(int(a.size) * a.dtype.itemsize for a in args)
                         + L * NP * FP * 4)                 # output written per layer
    cost = pl.CostEstimate(flops=flops,
                           transcendentals=int(L * NP * NP),
                           bytes_accessed=bytes_accessed)

    return pl.pallas_call(
        functools.partial(gat_block_kernel, t_dst=T),
        out_shape=jax.ShapeDtypeStruct((NP, FP), jnp.float32),
        grid=grid,
        in_specs=[
            pl.BlockSpec(memory_space=pl.ANY),              # x stays in HBM, copied once
            pl.BlockSpec((1, T, NP), lambda l, t: (l, t, 0)),   # bf16 edge-logit map (mask folded in)
            pl.BlockSpec((1, FP, FP), lambda l, t: (l, 0, 0)),  # W (bf16)
            pl.BlockSpec((1, FP, 1), lambda l, t: (l, 0, 0)),   # att_dst (bf16)
            pl.BlockSpec((1, 1, FP), lambda l, t: (l, 0, 0)),   # att_src (bf16)
            pl.BlockSpec((1, 1, FP), lambda l, t: (l, 0, 0)),   # bias
            pl.BlockSpec((1, 1, FP), lambda l, t: (l, 0, 0)),   # LN gamma
            pl.BlockSpec((1, 1, FP), lambda l, t: (l, 0, 0)),   # LN beta
            pl.BlockSpec((1, 1, FP), lambda l, t: (l, 0, 0)),   # feature mask / count
        ],
        out_specs=pl.BlockSpec((T, FP), lambda l, t: (t, 0)),
        scratch_shapes=[
            pltpu.VMEM((NP, FP), jnp.float32),    # xbuf: layer input / next layer input
            pltpu.VMEM((NP, FP), jnp.bfloat16),   # hbuf: projected features h
            pltpu.VMEM((1, NP), jnp.float32),     # a_src row
        ],
        compiler_params=pltpu.CompilerParams(
            # Layer l+1 depends on ALL dst tiles of layer l through the VMEM
            # scratch, so both grid axes must stay sequential.
            dimension_semantics=("arbitrary", "arbitrary"),
            # 48 MiB: above the 32 MiB default, still safe on v7x's 64 MiB VMEM.
            vmem_limit_bytes=48 * 1024 * 1024,
        ),
        cost_estimate=cost,
    )(*args)


def init_gat_block_params(key, config):
    in_c = config["node_features"]
    hid = config["hidden_features"]
    out_c = config["node_embed_size"]
    num_layers = config["num_layers"]
    ef = config["edge_features"]

    dims = []
    if num_layers == 1:
        dims.append((in_c, out_c))
    else:
        prev = in_c
        for _ in range(num_layers - 1):
            dims.append((prev, hid))
            prev = hid
        dims.append((hid, out_c))

    def glorot(k, shape):
        lim = (6.0 / (shape[0] + shape[1])) ** 0.5
        return jax.random.uniform(k, shape, jnp.float32, -lim, lim)

    params = []
    for fi, fo in dims:
        key, k1, k2, k3, k4, k5 = jax.random.split(key, 6)
        params.append(dict(
            w_src=glorot(k1, (fi, fo)),        # lin_src weight (transposed)
            att_src=glorot(k2, (1, fo)),       # att_src (row form)
            att_dst=glorot(k3, (fo, 1)),       # att_dst (column form)
            w_edge=glorot(k4, (ef, fo)),       # lin_edge weight (transposed)
            att_edge=glorot(k5, (fo, 1)),      # att_edge (column form)
            bias=jnp.zeros((1, fo), jnp.float32),
            gamma=jnp.ones((1, fo), jnp.float32),   # LayerNorm weight
            beta=jnp.zeros((1, fo), jnp.float32),   # LayerNorm bias
        ))
    return params


def gat_block_forward(x, edge_index, edge_attr, params, num_nodes, *,
                      t_dst=DEF_T_DST):
    """Glue: densify the graph into masked edge-logit maps (adjacency folded
    in), pre-contract the edge features, pad & stack the per-layer parameters,
    then run the single fused Pallas kernel."""
    N = num_nodes
    out_c = params[-1]["w_src"].shape[1]
    feat_dims = [params[0]["w_src"].shape[0]] + [p["w_src"].shape[1] for p in params]
    FP = _round_up(max(feat_dims), LANE)
    NP = _round_up(N, LANE)

    src, dst = edge_index[0], edge_index[1]
    deg = jnp.zeros((NP,), jnp.float32).at[dst].add(1.0)   # in-degree (pre self-loops)
    idx_np = jnp.arange(NP)

    elogs, w_s, attd_s, atts_s = [], [], [], []
    bias_s, gamma_s, beta_s, sm_s = [], [], [], []
    for p in params:
        fi, fo = p["w_src"].shape
        # per-edge scalar logit:  e . (W_edge @ a_edge)   (exact for heads=1)
        v_edge = (p["w_edge"] @ p["att_edge"])[:, 0]                   # [E_feat]
        per_edge = edge_attr @ v_edge                                  # [M]
        # adjacency mask folded in: non-edges get -1e30 so the in-kernel softmax
        # ignores them without a separate mask stream.
        emap = jnp.full((NP, NP), NEG_FILL, jnp.float32).at[dst, src].set(per_edge)
        # self-loop attr = mean of incoming edge attrs (PyG fill_value='mean');
        # by linearity its logit is the mean of the incoming per-edge logits.
        # Padded / isolated rows get 0 so no softmax row is all -inf.
        sum_in = jnp.zeros((NP,), jnp.float32).at[dst].add(per_edge)
        self_val = sum_in / jnp.maximum(deg, 1.0)
        emap = emap.at[idx_np, idx_np].set(self_val)
        elogs.append(emap)

        w_s.append(jnp.zeros((FP, FP), jnp.float32).at[:fi, :fo].set(p["w_src"]))
        attd_s.append(jnp.zeros((FP, 1), jnp.float32).at[:fo, 0].set(p["att_dst"][:, 0]))
        atts_s.append(jnp.zeros((1, FP), jnp.float32).at[0, :fo].set(p["att_src"][0]))
        bias_s.append(jnp.zeros((1, FP), jnp.float32).at[0, :fo].set(p["bias"][0]))
        gamma_s.append(jnp.zeros((1, FP), jnp.float32).at[0, :fo].set(p["gamma"][0]))
        beta_s.append(jnp.zeros((1, FP), jnp.float32).at[0, :fo].set(p["beta"][0]))
        sm_s.append(jnp.zeros((1, FP), jnp.float32).at[0, :fo].set(1.0 / fo))

    # bf16 halves the HBM stream of the only L*N^2-sized array; f32 exponent
    # range is preserved so the -1e30 fill still underflows exp correctly.
    elog = jnp.stack(elogs).astype(jnp.bfloat16)                       # [L, NP, NP]
    w_stack = jnp.stack(w_s).astype(jnp.bfloat16)                      # [L, FP, FP]
    attd_stack = jnp.stack(attd_s).astype(jnp.bfloat16)                # [L, FP, 1]
    atts_stack = jnp.stack(atts_s).astype(jnp.bfloat16)                # [L, 1, FP]
    bias_stack = jnp.stack(bias_s)
    gamma_stack = jnp.stack(gamma_s)
    beta_stack = jnp.stack(beta_s)
    sm_stack = jnp.stack(sm_s)

    x_pad = jnp.zeros((NP, FP), jnp.float32).at[:N, :x.shape[1]].set(x)

    out = _gat_block_pallas(x_pad, elog, w_stack, attd_stack, atts_stack,
                            bias_stack, gamma_stack, beta_stack, sm_stack,
                            t_dst=t_dst)
    return out[:N, :out_c]


if __name__ == "__main__":
    config = dict(
        node_features=8,
        hidden_features=32,
        node_embed_size=16,
        num_layers=2,
        edge_features=4,
        non_linearity="relu",   # assumed torch.relu in the original config
    )
    N = 16

    key = jax.random.PRNGKey(0)
    kx, ke, kp = jax.random.split(key, 3)

    x = jax.random.normal(kx, (N, config["node_features"]), jnp.float32)

    # deterministic graph: each node i has outgoing edges to i+1, i+3, i+5 (mod N)
    srcs, dsts = [], []
    for i in range(N):
        for off in (1, 3, 5):
            srcs.append(i)
            dsts.append((i + off) % N)
    edge_index = jnp.array([srcs, dsts], dtype=jnp.int32)              # [2, M]
    edge_attr = jax.random.normal(
        ke, (edge_index.shape[1], config["edge_features"]), jnp.float32)

    params = init_gat_block_params(kp, config)

    out = gat_block_forward(x, edge_index, edge_attr, params, N)
    out = jax.block_until_ready(out)

    assert out.shape == (N, config["node_embed_size"])
    assert bool(jnp.all(jnp.isfinite(out)))
    print("KERNEL_OK")
</pallas_src>

<mosaic_0001>
module attributes {stable_mosaic.version = 11 : i64} {
  func.func @gat_block_kernel(%arg0: i32, %arg1: i32, %arg2: memref<128x128xf32, #tpu.memory_space<any>>, %arg3: memref<1x128x128xbf16, #tpu.memory_space<vmem>>, %arg4: memref<1x128x128xbf16, #tpu.memory_space<vmem>>, %arg5: memref<1x128x1xbf16, #tpu.memory_space<vmem>>, %arg6: memref<1x1x128xbf16, #tpu.memory_space<vmem>>, %arg7: memref<1x1x128xf32, #tpu.memory_space<vmem>>, %arg8: memref<1x1x128xf32, #tpu.memory_space<vmem>>, %arg9: memref<1x1x128xf32, #tpu.memory_space<vmem>>, %arg10: memref<1x1x128xf32, #tpu.memory_space<vmem>>, %arg11: memref<128x128xf32, #tpu.memory_space<vmem>>, %arg12: memref<128x128xf32, #tpu.memory_space<vmem>>, %arg13: memref<128x128xbf16, #tpu.memory_space<vmem>>, %arg14: memref<1x128xf32, #tpu.memory_space<vmem>>) attributes {dimension_semantics = [#tpu.dimension_semantics<arbitrary>, #tpu.dimension_semantics<arbitrary>], iteration_bounds = array<i64: 2, 1>, scalar_prefetch = 0 : i64, scratch_operands = 3 : i64, tpu.core_type = #tpu.core_type<tc>, window_params = [{}, {transform_indices = @transform_1, window_bounds = array<i64: 1, 128, 128>}, {transform_indices = @transform_2, window_bounds = array<i64: 1, 128, 128>}, {transform_indices = @transform_3, window_bounds = array<i64: 1, 128, 1>}, {transform_indices = @transform_4, window_bounds = array<i64: 1, 1, 128>}, {transform_indices = @transform_5, window_bounds = array<i64: 1, 1, 128>}, {transform_indices = @transform_6, window_bounds = array<i64: 1, 1, 128>}, {transform_indices = @transform_7, window_bounds = array<i64: 1, 1, 128>}, {transform_indices = @transform_8, window_bounds = array<i64: 1, 1, 128>}, {transform_indices = @transform_9, window_bounds = array<i64: 128, 128>}]} {
    %c0_i32 = arith.constant 0 : i32
    %0 = arith.cmpi eq, %arg0, %c0_i32 : i32
    %c0_i32_0 = arith.constant 0 : i32
    %1 = arith.cmpi eq, %arg1, %c0_i32_0 : i32
    %2 = arith.andi %0, %1 : i1
    %3 = arith.extui %2 : i1 to i32
    %c0_i32_1 = arith.constant 0 : i32
    %4 = arith.cmpi ne, %3, %c0_i32_1 : i32
    scf.if %4 {
      "tpu.region"() ({
        %76 = tpu.sem_alloc : memref<!tpu.dma_semaphore, #tpu.memory_space<semaphore_mem>>
        tpu.enqueue_dma source(%arg2 : memref<128x128xf32, #tpu.memory_space<any>>) target(%arg12 : memref<128x128xf32, #tpu.memory_space<vmem>>) target_semaphore(%76 : memref<!tpu.dma_semaphore, #tpu.memory_space<semaphore_mem>>)
        tpu.wait_dma2 semaphore(%76 : memref<!tpu.dma_semaphore, #tpu.memory_space<semaphore_mem>>) src(%arg2 : memref<128x128xf32, #tpu.memory_space<any>>) dst(%arg12 : memref<128x128xf32, #tpu.memory_space<vmem>>)
        tpu.yield
      }) : () -> ()
    } else {
    }
    %c0_i32_2 = arith.constant 0 : i32
    %5 = arith.cmpi eq, %arg1, %c0_i32_2 : i32
    %6 = arith.extui %5 : i1 to i32
    %c0_i32_3 = arith.constant 0 : i32
    %7 = arith.cmpi ne, %6, %c0_i32_3 : i32
    scf.if %7 {
      %c0_38 = arith.constant 0 : index
      %c0_39 = arith.constant 0 : index
      %76 = vector.load %arg12[%c0_38, %c0_39] : memref<128x128xf32, #tpu.memory_space<vmem>>, vector<128x128xf32>
      %77 = arith.truncf %76 : vector<128x128xf32> to vector<128x128xbf16>
      %c0_40 = arith.constant 0 : index
      %c0_41 = arith.constant 0 : index
      %c0_42 = arith.constant 0 : index
      %78 = vector.load %arg4[%c0_40, %c0_41, %c0_42] : memref<1x128x128xbf16, #tpu.memory_space<vmem>>, vector<1x128x128xbf16>
      %79 = vector.shape_cast %78 : vector<1x128x128xbf16> to vector<128x128xbf16>
      %cst_43 = arith.constant dense<0.000000e+00> : vector<128x128xf32>
      %80 = tpu.matmul %77, %79, %cst_43 {dimension_numbers = #tpu.dot_dimension_numbers<[1], [0], [0], [1], [0, 0, 1, 1], [], []>} : vector<128x128xbf16>, vector<128x128xbf16>, vector<128x128xf32> -> vector<128x128xf32>
      %81 = arith.truncf %80 : vector<128x128xf32> to vector<128x128xbf16>
      %c0_44 = arith.constant 0 : index
      %c0_45 = arith.constant 0 : index
      %82 = vector.load %arg13[%c0_44, %c0_45] : memref<128x128xbf16, #tpu.memory_space<vmem>>, vector<128x128xbf16>
      tpu.vector_store %arg13[%c0_44, %c0_45], %81 {strides = array<i32>} : memref<128x128xbf16, #tpu.memory_space<vmem>>, vector<128x128xbf16>,
      %c0_46 = arith.constant 0 : index
      %c0_47 = arith.constant 0 : index
      %c0_48 = arith.constant 0 : index
      %83 = vector.load %arg6[%c0_46, %c0_47, %c0_48] : memref<1x1x128xbf16, #tpu.memory_space<vmem>>, vector<1x1x128xbf16>
      %84 = vector.shape_cast %83 : vector<1x1x128xbf16> to vector<1x128xbf16>
      %cst_49 = arith.constant dense<0.000000e+00> : vector<1x128xf32>
      %85 = tpu.matmul %84, %81, %cst_49 {dimension_numbers = #tpu.dot_dimension_numbers<[1], [1], [0], [0], [0, 0, 1, 0], [], []>} : vector<1x128xbf16>, vector<128x128xbf16>, vector<1x128xf32> -> vector<1x128xf32>
      %c0_50 = arith.constant 0 : index
      %c0_51 = arith.constant 0 : index
      %86 = vector.load %arg14[%c0_50, %c0_51] : memref<1x128xf32, #tpu.memory_space<vmem>>, vector<1x128xf32>
      tpu.vector_store %arg14[%c0_50, %c0_51], %85 {strides = array<i32>} : memref<1x128xf32, #tpu.memory_space<vmem>>, vector<1x128xf32>,
    } else {
    }
    %c128_i32 = arith.constant 128 : i32
    %8 = arith.muli %arg1, %c128_i32 : i32
    %9 = tpu.assume_multiple %8, 128 : i32
    %10 = arith.index_cast %9 : i32 to index
    %c0 = arith.constant 0 : index
    %11 = vector.load %arg13[%10, %c0] : memref<128x128xbf16, #tpu.memory_space<vmem>>, vector<128x128xbf16>
    %c0_4 = arith.constant 0 : index
    %c0_5 = arith.constant 0 : index
    %c0_6 = arith.constant 0 : index
    %12 = vector.load %arg5[%c0_4, %c0_5, %c0_6] : memref<1x128x1xbf16, #tpu.memory_space<vmem>>, vector<1x128x1xbf16>
    %13 = vector.shape_cast %12 : vector<1x128x1xbf16> to vector<128x1xbf16>
    %cst = arith.constant dense<0.000000e+00> : vector<128x1xf32>
    %14 = tpu.matmul %11, %13, %cst {dimension_numbers = #tpu.dot_dimension_numbers<[1], [0], [0], [1], [0, 0, 1, 1], [], []>} : vector<128x128xbf16>, vector<128x1xbf16>, vector<128x1xf32> -> vector<128x1xf32>
    %c0_7 = arith.constant 0 : index
    %c0_8 = arith.constant 0 : index
    %15 = vector.load %arg14[%c0_7, %c0_8] : memref<1x128xf32, #tpu.memory_space<vmem>>, vector<1x128xf32>
    %16 = vector.broadcast %14 : vector<128x1xf32> to vector<128x128xf32>
    %17 = vector.broadcast %15 : vector<1x128xf32> to vector<128x128xf32>
    %18 = arith.addf %16, %17 : vector<128x128xf32>
    %c0_9 = arith.constant 0 : index
    %c0_10 = arith.constant 0 : index
    %c0_11 = arith.constant 0 : index
    %19 = vector.load %arg3[%c0_9, %c0_10, %c0_11] : memref<1x128x128xbf16, #tpu.memory_space<vmem>>, vector<1x128x128xbf16>
    %20 = vector.shape_cast %19 : vector<1x128x128xbf16> to vector<128x128xbf16>
    %21 = arith.extf %20 : vector<128x128xbf16> to vector<128x128xf32>
    %22 = arith.addf %18, %21 : vector<128x128xf32>
    %cst_12 = arith.constant 0.000000e+00 : f32
    %23 = vector.broadcast %cst_12 : f32 to vector<128x128xf32>
    %24 = arith.cmpf oge, %22, %23 : vector<128x128xf32>
    %cst_13 = arith.constant 2.000000e-01 : f32
    %25 = vector.broadcast %cst_13 : f32 to vector<128x128xf32>
    %26 = arith.mulf %25, %22 : vector<128x128xf32>
    %27 = arith.select %24, %22, %26 : vector<128x128xi1>, vector<128x128xf32>
    %cst_14 = arith.constant dense<0xFF800000> : vector<128xf32>
    %28 = vector.multi_reduction <maximumf>, %27, %cst_14 [1] : vector<128x128xf32> to vector<128xf32>
    %29 = vector.shape_cast %28 : vector<128xf32> to vector<128x1xf32>
    %30 = vector.broadcast %29 : vector<128x1xf32> to vector<128x128xf32>
    %31 = arith.subf %27, %30 : vector<128x128xf32>
    %32 = math.exp %31 : vector<128x128xf32>
    %cst_15 = arith.constant dense<0.000000e+00> : vector<128xf32>
    %33 = vector.multi_reduction <add>, %32, %cst_15 [1] : vector<128x128xf32> to vector<128xf32>
    %34 = vector.shape_cast %33 : vector<128xf32> to vector<128x1xf32>
    %35 = arith.truncf %32 : vector<128x128xf32> to vector<128x128xbf16>
    %c0_16 = arith.constant 0 : index
    %c0_17 = arith.constant 0 : index
    %36 = vector.load %arg13[%c0_16, %c0_17] : memref<128x128xbf16, #tpu.memory_space<vmem>>, vector<128x128xbf16>
    %cst_18 = arith.constant dense<0.000000e+00> : vector<128x128xf32>
    %37 = tpu.matmul %35, %36, %cst_18 {dimension_numbers = #tpu.dot_dimension_numbers<[1], [0], [0], [1], [0, 0, 1, 1], [], []>} : vector<128x128xbf16>, vector<128x128xbf16>, vector<128x128xf32> -> vector<128x128xf32>
    %38 = tpu.reciprocal %34 : vector<128x1xf32> -> vector<128x1xf32>
    %39 = vector.broadcast %38 : vector<128x1xf32> to vector<128x128xf32>
    %40 = arith.mulf %37, %39 : vector<128x128xf32>
    %c0_19 = arith.constant 0 : index
    %c0_20 = arith.constant 0 : index
    %c0_21 = arith.constant 0 : index
    %41 = vector.load %arg7[%c0_19, %c0_20, %c0_21] : memref<1x1x128xf32, #tpu.memory_space<vmem>>, vector<1x1x128xf32>
    %42 = vector.shape_cast %41 : vector<1x1x128xf32> to vector<1x128xf32>
    %43 = vector.broadcast %42 : vector<1x128xf32> to vector<128x128xf32>
    %44 = arith.addf %40, %43 : vector<128x128xf32>
    %cst_22 = arith.constant 0.000000e+00 : f32
    %45 = vector.broadcast %cst_22 : f32 to vector<128x128xf32>
    %46 = arith.maximumf %44, %45 : vector<128x128xf32>
    %c0_23 = arith.constant 0 : index
    %c0_24 = arith.constant 0 : index
    %c0_25 = arith.constant 0 : index
    %47 = vector.load %arg10[%c0_23, %c0_24, %c0_25] : memref<1x1x128xf32, #tpu.memory_space<vmem>>, vector<1x1x128xf32>
    %48 = vector.shape_cast %47 : vector<1x1x128xf32> to vector<1x128xf32>
    %49 = vector.broadcast %48 : vector<1x128xf32> to vector<128x128xf32>
    %50 = arith.mulf %46, %49 : vector<128x128xf32>
    %cst_26 = arith.constant dense<0.000000e+00> : vector<128xf32>
    %51 = vector.multi_reduction <add>, %50, %cst_26 [1] : vector<128x128xf32> to vector<128xf32>
    %52 = vector.shape_cast %51 : vector<128xf32> to vector<128x1xf32>
    %53 = vector.broadcast %52 : vector<128x1xf32> to vector<128x128xf32>
    %54 = arith.subf %46, %53 : vector<128x128xf32>
    %55 = arith.mulf %54, %54 : vector<128x128xf32>
    %56 = vector.broadcast %48 : vector<1x128xf32> to vector<128x128xf32>
    %57 = arith.mulf %55, %56 : vector<128x128xf32>
    %cst_27 = arith.constant dense<0.000000e+00> : vector<128xf32>
    %58 = vector.multi_reduction <add>, %57, %cst_27 [1] : vector<128x128xf32> to vector<128xf32>
    %59 = vector.shape_cast %58 : vector<128xf32> to vector<128x1xf32>
    %cst_28 = arith.constant 9.99999974E-6 : f32
    %60 = vector.broadcast %cst_28 : f32 to vector<128x1xf32>
    %61 = arith.addf %59, %60 : vector<128x1xf32>
    %62 = math.rsqrt %61 : vector<128x1xf32>
    %63 = vector.broadcast %62 : vector<128x1xf32> to vector<128x128xf32>
    %64 = arith.mulf %54, %63 : vector<128x128xf32>
    %c0_29 = arith.constant 0 : index
    %c0_30 = arith.constant 0 : index
    %c0_31 = arith.constant 0 : index
    %65 = vector.load %arg8[%c0_29, %c0_30, %c0_31] : memref<1x1x128xf32, #tpu.memory_space<vmem>>, vector<1x1x128xf32>
    %66 = vector.shape_cast %65 : vector<1x1x128xf32> to vector<1x128xf32>
    %67 = vector.broadcast %66 : vector<1x128xf32> to vector<128x128xf32>
    %68 = arith.mulf %64, %67 : vector<128x128xf32>
    %c0_32 = arith.constant 0 : index
    %c0_33 = arith.constant 0 : index
    %c0_34 = arith.constant 0 : index
    %69 = vector.load %arg9[%c0_32, %c0_33, %c0_34] : memref<1x1x128xf32, #tpu.memory_space<vmem>>, vector<1x1x128xf32>
    %70 = vector.shape_cast %69 : vector<1x1x128xf32> to vector<1x128xf32>
    %71 = vector.broadcast %70 : vector<1x128xf32> to vector<128x128xf32>
    %72 = arith.addf %68, %71 : vector<128x128xf32>
    %c0_35 = arith.constant 0 : index
    %c0_36 = arith.constant 0 : index
    %73 = vector.load %arg11[%c0_35, %c0_36] : memref<128x128xf32, #tpu.memory_space<vmem>>, vector<128x128xf32>
    tpu.vector_store %arg11[%c0_35, %c0_36], %72 {strides = array<i32>} : memref<128x128xf32, #tpu.memory_space<vmem>>, vector<128x128xf32>,
    %74 = arith.index_cast %9 : i32 to index
    %c0_37 = arith.constant 0 : index
    %75 = vector.load %arg12[%74, %c0_37] : memref<128x128xf32, #tpu.memory_space<vmem>>, vector<128x128xf32>
    tpu.vector_store %arg12[%74, %c0_37], %72 {strides = array<i32>} : memref<128x128xf32, #tpu.memory_space<vmem>>, vector<128x128xf32>,
    return
  }
  func.func @transform_1(%arg0: i32, %arg1: i32) -> (i32, i32, i32) {
    %c0_i32 = arith.constant 0 : i32
    %c0_i32_0 = arith.constant 0 : i32
    return %arg0, %arg1, %c0_i32 : i32, i32, i32
  }
  func.func @transform_2(%arg0: i32, %arg1: i32) -> (i32, i32, i32) {
    %c0_i32 = arith.constant 0 : i32
    %c0_i32_0 = arith.constant 0 : i32
    %c0_i32_1 = arith.constant 0 : i32
    return %arg0, %c0_i32, %c0_i32_0 : i32, i32, i32
  }
  func.func @transform_3(%arg0: i32, %arg1: i32) -> (i32, i32, i32) {
    %c0_i32 = arith.constant 0 : i32
    %c0_i32_0 = arith.constant 0 : i32
    %c0_i32_1 = arith.constant 0 : i32
    return %arg0, %c0_i32, %c0_i32_0 : i32, i32, i32
  }
  func.func @transform_4(%arg0: i32, %arg1: i32) -> (i32, i32, i32) {
    %c0_i32 = arith.constant 0 : i32
    %c0_i32_0 = arith.constant 0 : i32
    %c0_i32_1 = arith.constant 0 : i32
    return %arg0, %c0_i32, %c0_i32_0 : i32, i32, i32
  }
  func.func @transform_5(%arg0: i32, %arg1: i32) -> (i32, i32, i32) {
    %c0_i32 = arith.constant 0 : i32
    %c0_i32_0 = arith.constant 0 : i32
    %c0_i32_1 = arith.constant 0 : i32
    return %arg0, %c0_i32, %c0_i32_0 : i32, i32, i32
  }
  func.func @transform_6(%arg0: i32, %arg1: i32) -> (i32, i32, i32) {
    %c0_i32 = arith.constant 0 : i32
    %c0_i32_0 = arith.constant 0 : i32
    %c0_i32_1 = arith.constant 0 : i32
    return %arg0, %c0_i32, %c0_i32_0 : i32, i32, i32
  }
  func.func @transform_7(%arg0: i32, %arg1: i32) -> (i32, i32, i32) {
    %c0_i32 = arith.constant 0 : i32
    %c0_i32_0 = arith.constant 0 : i32
    %c0_i32_1 = arith.constant 0 : i32
    return %arg0, %c0_i32, %c0_i32_0 : i32, i32, i32
  }
  func.func @transform_8(%arg0: i32, %arg1: i32) -> (i32, i32, i32) {
    %c0_i32 = arith.constant 0 : i32
    %c0_i32_0 = arith.constant 0 : i32
    %c0_i32_1 = arith.constant 0 : i32
    return %arg0, %c0_i32, %c0_i32_0 : i32, i32, i32
  }
  func.func @transform_9(%arg0: i32, %arg1: i32) -> (i32, i32) {
    %c0_i32 = arith.constant 0 : i32
    %c0_i32_0 = arith.constant 0 : i32
    return %arg1, %c0_i32 : i32, i32
  }
}

</mosaic_0001>

<bundles_post_ra>
// kernel: tpu_custom_call.1
= control target key start
LH: loop header
LB: loop body
LE: loop exit
PB: predicated region body
PF: predicated region fallthrough
CT: control target
= control target key end

     0   :  { %s3257_s0 = inlined_call_operand.vmem [shape: f32[128,128], index: 0, kind: input, shape index: {}]   ;;  %s3258_s1 = inlined_call_operand.hbm [shape: bf16[2,128,128], index: 1, kind: input, shape index: {}]   ;;  %s3259_s2 = inlined_call_operand.hbm [shape: bf16[2,128,128], index: 2, kind: input, shape index: {}]   ;;  %s3260_s3 = inlined_call_operand.vmem [shape: bf16[2,128,1], index: 3, kind: input, shape index: {}]   ;;  %s3261_s4 = inlined_call_operand.vmem [shape: bf16[2,1,128], index: 4, kind: input, shape index: {}]   ;;  %s3262_s5 = inlined_call_operand.vmem [shape: f32[2,1,128], index: 5, kind: input, shape index: {}]   ;;  %s3263_s6 = inlined_call_operand.vmem [shape: f32[2,1,128], index: 6, kind: input, shape index: {}]   ;;  %s3264_s7 = inlined_call_operand.vmem [shape: f32[2,1,128], index: 7, kind: input, shape index: {}]   ;;  %s3265_s8 = inlined_call_operand.vmem [shape: f32[2,1,128], index: 8, kind: input, shape index: {}]   ;;  %s3266_s9 = inlined_call_operand.hbm [shape: f32[128,128], index: 9, kind: output, shape index: {}]  }
   0x1   :  { %3273 = sst [smem:[#allocation20_spill]] %s3258_s1 }
   0x2   :  { %3274 = sst [smem:[#allocation21_spill]] %s3259_s2 }
   0x3   :  { %14 = vsyncpa [#allocation6], 0 }
   0x4   :  { %16 = vsyncpa [#allocation6 + $0x1], 0 }
   0x5   :  { %17 = vsyncpa [#allocation9], 0 }
   0x6   :  { %19 = vsyncpa [#allocation9 + $0x1], 0 }
   0x7   :  { %20 = vsyncpa [#allocation7], 0  ;;  %s2545_s30 = smov 0   ;;  %s2547_s10 = smov 0  }
   0x8   :  { %s2549_s11 = smov 0   ;;  %s2551_s12 = smov 0  }
   0x9   :  { %s2553_s13 = smov 0   ;;  %s2555_s14 = smov 0  }
   0xa LB: > { %3275 = sst [smem:[#allocation17_spill]] %s2479_s13  ;;  %s3267_s15 = sadd.s32 4294967295, %s2483_s14   ;;  %s2483_s14 = sphi %s2555_s14, %s26_s14   ;;  %s2479_s13 = sphi %s2553_s13, %s3291_s13   ;;  %s2475_s12 = sphi %s2551_s12, %s3290_s12   ;;  %s2471_s11 = sphi %s2549_s11, %s3294_s11   ;;  %s2467_s10 = sphi %s2547_s10, %s3293_s10   ;;  %s2463_s30 = sphi %s2545_s30, %s3292_s30  }
   0xb   : > { %s38_s16 = sadd.s32 1, %s2479_s13  ;;  %s47_s17 = sadd.s32 1, %s2471_s11 }
   0xc   : > { %p40_p0 = scmp.ge.s32.totalorder %s38_s16, 2  ;;  %p54_p1 = scmp.ne.s32.totalorder %s2471_s11, %s2467_s10 }
   0xd   : > { %p55_p2 = scmp.eq.s32.totalorder %s2483_s14, 0  ;;  %p60_p4 = scmp.ne.s32.totalorder %s2467_s10, %s2463_s30 }
   0xe   : > { %s3296_s16 = smov (%p40_p0, %s38_s16), 0  ;;  %p61_p5 = scmp.eq.s32.totalorder %s3267_s15, 0 }
   0xf   : > { %3276 = sst [smem:[#allocation18_spill]] %s3296_s16  ;;  %p2581_p3 = por %p55_p2, %p54_p1 }
  0x10   : > { %s42_s19 = ssub.s32 %s2479_s13, %s3296_s16  ;;  %p2590_p7 = por %p61_p5, %p60_p4 }
  0x11   : > { %p45_p6 = scmp.eq.s32.totalorder %s42_s19, 0  ;;  %p2164_p8 = scmp.lt.s32.totalorder %s2483_s14, 2 }
  0x12   : > { %s3278_s20 = scalar_select %p2590_p7, 1, 0 }
  0x13   : > { %s2596_s21 = scalar_select %p45_p6, %s2471_s11, %s47_s17  }
  0x14   : > { %s2599_s22 = sand.u32 1, %s2471_s11   ;;  %s1933_s23 = sshll.u32 %s2479_s13, 10 }
  0x15   : > { %3279 = sst [smem:[#allocation19_spill]] %s2596_s21  ;;  %s3268_s24 = sshll.u32 %s2599_s22, 6 }
  0x16   : > { %s3280_s1 = sld [smem:[#allocation20_spill]]  ;;  %s296_s28 = scalar_lea.vmem [#allocation5], %s3268_s24 }
  0x17   : > { %s305_s29 = sshll.u32 %s296_s28, 4  ;;  %p2614_p9 = pnand %p2164_p8, %p2581_p3  ;;  %s2618_s29 = int_to_ptr.vmem [resolvable:$true] %s305_s29 }
  0x18   : > { %s293_s17 = scalar_lea.sflag [#allocation6], %s2599_s22 }
  0x19   : > { %p2339_p11 = pneg %p2614_p9 }
  0x1c   : > { %s2608_s27 = scalar_lea.hbm %s3280_s1, %s1933_s23  ;;  %s2342_s18 = scalar_lea.hbm %s3280_s1, 2048 }
  0x1d   : > { %s2337_s19 = scalar_lea.hbm %s2608_s27, 1024  ;;  %p2343_p0 = scmp.lt.u32.totalorder %s2608_s27, %s3280_s1 }
  0x1e   : > { %p2338_p10 = scmp.ne.s32.totalorder %s2608_s27, %s2337_s19  ;;  %p2344_p1 = scmp.lt.u32.totalorder %s2342_s18, %s2337_s19 }
  0x1f   : > { %p2346_p3 = scmp.lt.u32.totalorder %s2337_s19, %s2608_s27 }
  0x20   : > { %p2340_p12 = pnand %p2339_p11, %p2338_p10  ;;  %p2345_p2 = por %p2344_p1, %p2343_p0 }
  0x22   : > { %p2341_p13 = pneg %p2340_p12  ;;  %p2347_p4 = por %p2346_p3, %p2345_p2 }
  0x24   : > { %p2348_p5 = pnand %p2347_p4, %p2341_p13 }
  0x26   : > { %2351 = shalt.err (!%p2348_p5)
}
  0x27   : > { %s2352_s24 = scalar_lea.vmem %s2618_s29, 1024  ;;  %s2485_s25 = smov [#allocation5]  }
  0x28   : > { %p2353_p6 = scmp.ne.s32.totalorder %s2618_s29, %s2352_s24  ;;  %s2357_s26 = sshll.u32 %s2485_s25, 4  ;;  %s2358_s26 = int_to_ptr.vmem [resolvable:$false] %s2357_s26 }
  0x29   : > { %s2359_s15 = scalar_lea.vmem %s2358_s26, 2048  ;;  %p2360_p12 = scmp.lt.s32.totalorder %s2618_s29, %s2358_s26 }
  0x2a   : > { %p2355_p8 = pnand %p2353_p6, %p2339_p11  ;;  %p2361_p0 = scmp.lt.s32.totalorder %s2359_s15, %s2352_s24 }
  0x2c   : > { %p2356_p10 = pneg %p2355_p8  ;;  %p2362_p1 = por %p2361_p0, %p2360_p12 }
  0x2e   : > { %p2363_p2 = pnand %p2362_p1, %p2356_p10 }
  0x30   : > { %2366 = shalt.err (!%p2363_p2)
}
  0x31   : > { %s3270_s19 = smov 64   ;;  %s2487_s18 = smov 4  }
  0x32   : > { %2160 = dma.hbm_to_vmem [thread:$0]  (!%p2614_p9), %s2608_s27, 1024, %s2618_s29, %s293_s17, %s3270_s19, %s3270_s19, %s2487_s18  }
  0x33   : > { %p1902_p13 = scmp.ge.s32.totalorder %s2483_s14, 1  ;;  %p372_p3 = scmp.lt.s32.totalorder %s2483_s14, 3 }
  0x34   : > { %s3283_s2 = sld [smem:[#allocation21_spill]]  ;;  %s3284_s15 = sshll.u32 %s2599_s22, 6 }
  0x35   : > { %p2653_p4 = pnand %p1902_p13, %p372_p3  ;;  %s319_s1 = scalar_lea.vmem [#allocation8], %s3284_s15 }
  0x36   : > { %s326_s16 = sshll.u32 %s319_s1, 4  ;;  %s316_s27 = scalar_lea.sflag [#allocation9], %s2599_s22  ;;  %s2666_s16 = int_to_ptr.vmem [resolvable:$true] %s326_s16 }
  0x3a   : > { %s2662_s26 = scalar_lea.hbm %s3283_s2, %s1933_s23  ;;  %s2372_s23 = scalar_lea.hbm %s3283_s2, 2048 }
  0x3b   : > { %s2367_s29 = scalar_lea.hbm %s2662_s26, 1024  ;;  %p2373_p10 = scmp.lt.u32.totalorder %s2662_s26, %s3283_s2 }
  0x3c   : > { %p2368_p5 = scmp.ne.s32.totalorder %s2662_s26, %s2367_s29  ;;  %p2374_p12 = scmp.lt.u32.totalorder %s2372_s23, %s2367_s29 }
  0x3d   : > { %p2376_p1 = scmp.lt.u32.totalorder %s2367_s29, %s2662_s26 }
  0x3e   : > { %p2370_p6 = pnand %p2368_p5, %p2339_p11  ;;  %p2375_p0 = por %p2374_p12, %p2373_p10 }
  0x40   : > { %p2371_p8 = pneg %p2370_p6  ;;  %p2377_p2 = por %p2376_p1, %p2375_p0 }
  0x42   : > { %p2378_p13 = pnand %p2377_p2, %p2371_p8 }
  0x44   : > { %2381 = shalt.err (!%p2378_p13)
}
  0x45   : > { %s2382_s1 = scalar_lea.vmem %s2666_s16, 1024  ;;  %s2488_s15 = smov [#allocation8]  }
  0x46   : > { %p2383_p3 = scmp.ne.s32.totalorder %s2666_s16, %s2382_s1  ;;  %s2387_s17 = sshll.u32 %s2488_s15, 4  ;;  %s2388_s17 = int_to_ptr.vmem [resolvable:$false] %s2387_s17 }
  0x47   : > { %s2389_s19 = scalar_lea.vmem %s2388_s17, 2048  ;;  %p2390_p7 = scmp.lt.s32.totalorder %s2666_s16, %s2388_s17 }
  0x48   : > { %p2385_p5 = pnand %p2383_p3, %p2339_p11  ;;  %p2391_p10 = scmp.lt.s32.totalorder %s2389_s19, %s2382_s1 }
  0x4a   : > { %p2386_p6 = pneg %p2385_p5  ;;  %p2392_p12 = por %p2391_p10, %p2390_p7 }
  0x4c   : > { %p2393_p0 = pnand %p2392_p12, %p2386_p6 }
  0x4e   : > { %2396 = shalt.err (!%p2393_p0)
}
  0x4f   : > { %s3285_s29 = smov 64   ;;  %376 = sbr.rel (%p2653_p4) target bundleno = 1453 (0x5ad), region = 52 }
  0x50   : > { %2163 = dma.hbm_to_vmem [thread:$0]  (!%p2614_p9), %s2662_s26, 1024, %s2666_s16, %s316_s27, %s3285_s29, %s3285_s29, %s2487_s18  }
  0x51   : > { %s378_s28 = sand.u32 (!%p2653_p4), 1, %s2467_s10   ;;  %p3286_p7 = scmp.ne.s32.totalorder (!%p2653_p4), %s3278_s20, 0 }
  0x52   : > { %s1903_s23 = sshll.u32 (!%p2653_p4), %s378_s28, 6  ;;  %s379_s25 = scalar_lea.sflag (!%p2653_p4), [#allocation6], %s378_s28 }
  0x53   : > { %s2700_s1 = scalar_lea.vmem (!%p2653_p4), [#allocation5], %s1903_s23 }
  0x56   : > { %2448 = dma.done.wait (%p3286_p7), %s379_s25, 1024  }
  0x57   : > { %2450 = vsyncadd (%p3286_p7), %s379_s25, 4294966272  ;;  %s388_s22 = scalar_lea.sflag [#allocation9], %s378_s28  ;;  %s2706_s30 = scalar_lea.vmem [#allocation8], %s1903_s23 }
  0x58   : > { %2452 = dma.done.wait (%p3286_p7), %s388_s22, 1024  }
  0x59   : > { %2454 = vsyncadd (%p3286_p7), %s388_s22, 4294966272  ;;  %p445_p9 = scmp.lt.s32.totalorder %s2475_s12, 1  ;;  %p467_p11 = scmp.eq.s32.totalorder %s2475_s12, 0 }
  0x5b   : > { %s3298_s12 = smov (!%p445_p9, %s2475_s12), 1  ;;  %472 = sbr.rel (!%p467_p11) target bundleno = 110 (0x6e), region = 64 }
  0x5c   : > { %s1935_s16 = sshll.u32 %s3298_s12, 6  ;;  %s452_s26 = scalar_lea.vmem %s3261_s4, %s3298_s12 }
  0x5d   : > { %s2725_s15 = scalar_lea.vmem %s3260_s3, %s1935_s16  ;;  %s455_s29 = scalar_lea.vmem %s3262_s5, %s3298_s12 }
  0x5e   : > { %s458_s25 = scalar_lea.vmem %s3263_s6, %s3298_s12  ;;  %s461_s13 = scalar_lea.vmem %s3264_s7, %s3298_s12 }
  0x5f   : > { %s464_s24 = scalar_lea.vmem %s3265_s8, %s3298_s12 }
  0x62   : > { %v505_v0 = vld [vmem:[%s3257_s0] sm:$0xff]  ;;  %v507_v1 = vld [vmem:[%s3257_s0 + $0x8] sm:$0xff]  ;;  %v509_v2 = vld [vmem:[%s3257_s0 + $0x10] sm:$0xff] }
  0x63   : > { %506 = vst [vmem:[#allocation2] sm:$0xff] %v505_v0  ;;  %508 = vst [vmem:[#allocation2 + $0x8] sm:$0xff] %v507_v1  ;;  %v511_v3 = vld [vmem:[%s3257_s0 + $0x18] sm:$0xff]  ;;  %v513_v4 = vld [vmem:[%s3257_s0 + $0x20] sm:$0xff] }
  0x64   : > { %510 = vst [vmem:[#allocation2 + $0x10] sm:$0xff] %v509_v2  ;;  %v515_v5 = vld [vmem:[%s3257_s0 + $0x28] sm:$0xff]  ;;  %512 = vst [vmem:[#allocation2 + $0x18] sm:$0xff] %v511_v3  ;;  %v517_v6 = vld [vmem:[%s3257_s0 + $0x30] sm:$0xff] }
  0x65   : > { %514 = vst [vmem:[#allocation2 + $0x20] sm:$0xff] %v513_v4  ;;  %516 = vst [vmem:[#allocation2 + $0x28] sm:$0xff] %v515_v5  ;;  %v519_v7 = vld [vmem:[%s3257_s0 + $0x38] sm:$0xff]  ;;  %v521_v8 = vld [vmem:[%s3257_s0 + $0x40] sm:$0xff] }
  0x66   : > { %518 = vst [vmem:[#allocation2 + $0x30] sm:$0xff] %v517_v6  ;;  %520 = vst [vmem:[#allocation2 + $0x38] sm:$0xff] %v519_v7  ;;  %v523_v9 = vld [vmem:[%s3257_s0 + $0x48] sm:$0xff]  ;;  %v525_v10 = vld [vmem:[%s3257_s0 + $0x50] sm:$0xff] }
  0x67   : > { %522 = vst [vmem:[#allocation2 + $0x40] sm:$0xff] %v521_v8  ;;  %v527_v11 = vld [vmem:[%s3257_s0 + $0x58] sm:$0xff]  ;;  %524 = vst [vmem:[#allocation2 + $0x48] sm:$0xff] %v523_v9  ;;  %v529_v12 = vld [vmem:[%s3257_s0 + $0x60] sm:$0xff] }
  0x68   : > { %526 = vst [vmem:[#allocation2 + $0x50] sm:$0xff] %v525_v10  ;;  %528 = vst [vmem:[#allocation2 + $0x58] sm:$0xff] %v527_v11  ;;  %v531_v13 = vld [vmem:[%s3257_s0 + $0x68] sm:$0xff]  ;;  %v533_v14 = vld [vmem:[%s3257_s0 + $0x70] sm:$0xff] }
  0x69   : > { %530 = vst [vmem:[#allocation2 + $0x60] sm:$0xff] %v529_v12  ;;  %532 = vst [vmem:[#allocation2 + $0x68] sm:$0xff] %v531_v13  ;;  %v535_v15 = vld [vmem:[%s3257_s0 + $0x78] sm:$0xff] }
  0x6a   : > { %534 = vst [vmem:[#allocation2 + $0x70] sm:$0xff] %v533_v14  ;;  %536 = vst [vmem:[#allocation2 + $0x78] sm:$0xff] %v535_v15 }
  0x6b   : > { %544 = vsyncadd [#allocation11], 2048 }
  0x6c   : > { %2455 = dma.done.wait [#allocation11], 2048 }
  0x6d   : > { %2456 = vsyncadd [#allocation11], 4294965248 }
  0x6e PF: > { %v2225_v16 = vld [vmem:[%s2706_s30] sm:$0xff]   ;;  %v2226_v17 = vld [vmem:[%s2706_s30 + $0x8] sm:$0xff]   ;;  %v2227_v18 = vld [vmem:[%s2706_s30 + $0x10] sm:$0xff]   ;;  %v2489_v56 = vmov 0.0   ;;  %vm2490_vm0 = vmmov 0   ;;  %v2491_v57 = vmov 0  }
  0x6f   : > { %2033 = vmatprep.subr.bf16.mxu1 %v2225_v16  ;;  %v2228_v19 = vld [vmem:[%s2706_s30 + $0x18] sm:$0xff]   ;;  %v552_v21 = vld [vmem:[#allocation2 + $0x8] sm:$0xff]  ;;  %v2235_v27 = vld [vmem:[%s2725_s15 + $0x10] sm:$0xff]   ;;  %2223 = vset.pattern.permute.xlu1 %v2491_v57  ;;  %s2492_s12 = smov [#allocation10]  }
  0x70   : > { %2034 = vmatpush3.bf16.msra.mxu1 %v2225_v16  ;;  %v551_v20 = vld [vmem:[#allocation2] sm:$0xff]  ;;  %v2234_v25 = vld [vmem:[%s2725_s15 + $0x8] sm:$0xff]   ;;  %v2231_v28 = vld [vmem:[%s2706_s30 + $0x30] sm:$0xff]   ;;  %2224 = vset.pattern.permute.xlu0 %v2491_v57 }
  0x71   : > { %2035 = vmatprep.subr.bf16.mxu1 %v2226_v17  ;;  %v567_v22 = vpack.c.bf16 %v552_v21, %v551_v20  ;;  %v2229_v23 = vld [vmem:[%s2706_s30 + $0x20] sm:$0xff]   ;;  %v2230_v26 = vld [vmem:[%s2706_s30 + $0x28] sm:$0xff]   ;;  %v2236_v29 = vld [vmem:[%s2725_s15 + $0x18] sm:$0xff]  }
  0x72   : > { %v2233_v24 = vld [vmem:[%s2725_s15] sm:$0xff]   ;;  %v553_v32 = vld [vmem:[#allocation2 + $0x10] sm:$0xff]  ;;  %v554_v33 = vld [vmem:[#allocation2 + $0x18] sm:$0xff] }
  0x73   : > { %2049 = vmatprep.mubr.bf16.mxu1 %v567_v22  ;;  %2085 = vmatprep.subr.bf16.mxu0 %v2233_v24  ;;  %v2232_v30 = vld [vmem:[%s2706_s30 + $0x38] sm:$0xff]   ;;  %v556_v35 = vld [vmem:[#allocation2 + $0x28] sm:$0xff]  ;;  %v568_v36 = vpack.c.bf16 %v554_v33, %v553_v32  ;;  %v2239_v39 = vld [vmem:[%s2725_s15 + $0x30] sm:$0xff]  }
  0x74   : > { %2036 = vmatpush3.bf16.msra.mxu1 %v2226_v17  ;;  %2086 = vmatpush3.bf16.msra.mxu0 %v2233_v24  ;;  %v2237_v31 = vld [vmem:[%s2725_s15 + $0x20] sm:$0xff]   ;;  %v2238_v37 = vld [vmem:[%s2725_s15 + $0x28] sm:$0xff]   ;;  %v557_v40 = vld [vmem:[#allocation2 + $0x30] sm:$0xff] }
  0x75   : > { %2037 = vmatprep.subr.bf16.mxu1 %v2227_v18  ;;  %2087 = vmatprep.subr.bf16.mxu0 %v2234_v25  ;;  %v555_v34 = vld [vmem:[#allocation2 + $0x20] sm:$0xff]  ;;  %v558_v41 = vld [vmem:[#allocation2 + $0x38] sm:$0xff]  ;;  %v560_v43 = vld [vmem:[#allocation2 + $0x48] sm:$0xff] }
  0x76   : > { %v569_v38 = vpack.c.bf16 %v556_v35, %v555_v34  ;;  %v559_v42 = vld [vmem:[#allocation2 + $0x40] sm:$0xff]  ;;  %v570_v44 = vpack.c.bf16 %v558_v41, %v557_v40  ;;  %v561_v46 = vld [vmem:[#allocation2 + $0x50] sm:$0xff]  ;;  %v562_v47 = vld [vmem:[#allocation2 + $0x58] sm:$0xff] }
  0x77   : > { %v571_v45 = vpack.c.bf16 %v560_v43, %v559_v42  ;;  %v563_v48 = vld [vmem:[#allocation2 + $0x60] sm:$0xff]  ;;  %v564_v49 = vld [vmem:[#allocation2 + $0x68] sm:$0xff]  ;;  %v572_v50 = vpack.c.bf16 %v562_v47, %v561_v46  ;;  %v565_v52 = vld [vmem:[#allocation2 + $0x70] sm:$0xff] }
  0x78   : > { %2038 = vmatpush3.bf16.msra.mxu1 %v2227_v18  ;;  %2088 = vmatpush3.bf16.msra.mxu0 %v2234_v25  ;;  %v573_v51 = vpack.c.bf16 %v564_v49, %v563_v48  ;;  %v566_v53 = vld [vmem:[#allocation2 + $0x78] sm:$0xff]  ;;  %v752_v18 = vld [vmem:[%s452_s26] sm:$0x1]  ;;  %v1938_v40 = vld [vmem:[%s2700_s1] sm:$0xff]  }
  0x79   : > { %2039 = vmatprep.subr.bf16.mxu1 %v2228_v19  ;;  %2089 = vmatprep.subr.bf16.mxu0 %v2235_v27  ;;  %v574_v54 = vpack.c.bf16 %v566_v53, %v565_v52  ;;  %v2240_v55 = vld [vmem:[%s2725_s15 + $0x38] sm:$0xff]   ;;  %v1940_v52 = vunpack.c.h.bf16 %v1938_v40 }
  0x7a   : > { %v1970_v57 = vld [vmem:[%s2700_s1 + $0x10] sm:$0xff]  }
  0x7c   : > { %2040 = vmatpush3.bf16.msra.mxu1 %v2228_v19  ;;  %2090 = vmatpush3.bf16.msra.mxu0 %v2235_v27 }
  0x7d   : > { %2041 = vmatprep.subr.bf16.mxu1 %v2229_v23  ;;  %2091 = vmatprep.subr.bf16.mxu0 %v2236_v29 }
  0x80   : > { %2042 = vmatpush3.bf16.msra.mxu1 %v2229_v23  ;;  %2092 = vmatpush3.bf16.msra.mxu0 %v2236_v29 }
  0x81   : > { %2043 = vmatprep.subr.bf16.mxu1 %v2230_v26  ;;  %2093 = vmatprep.subr.bf16.mxu0 %v2237_v31 }
  0x84   : > { %2044 = vmatpush3.bf16.msra.mxu1 %v2230_v26  ;;  %2094 = vmatpush3.bf16.msra.mxu0 %v2237_v31 }
  0x85   : > { %2045 = vmatprep.subr.bf16.mxu1 %v2231_v28  ;;  %2095 = vmatprep.subr.bf16.mxu0 %v2238_v37 }
  0x88   : > { %2046 = vmatpush3.bf16.msra.mxu1 %v2231_v28  ;;  %2096 = vmatpush3.bf16.msra.mxu0 %v2238_v37 }
  0x89   : > { %2047 = vmatprep.subr.bf16.mxu1 %v2232_v30  ;;  %2097 = vmatprep.subr.bf16.mxu0 %v2239_v39 }
  0x8c   : > { %2048 = vmatpush3.bf16.msra.mxu1 %v2232_v30  ;;  %2098 = vmatpush3.bf16.msra.mxu0 %v2239_v39  ;;  %v1969_v39 = vld [vmem:[%s2700_s1 + $0x8] sm:$0xff]  }
  0x8d   : > { %2099 = vmatprep.subr.bf16.mxu0 %v2240_v55  ;;  %2065 = vmatprep.subr.bf16.mxu1 %v2489_v56  ;;  %v1943_v42 = vunpack.c.l.bf16 %v1969_v39 }
  0x8f   : > { %2050 = vmatmul.mubr.bf16.vlgmr.msra.gmra.mrb[0].mxu1 %v568_v36 }
  0x90   : > { %2053 = vmatprep.mubr.bf16.mxu1 %v569_v38  ;;  %2100 = vmatpush3.bf16.msra.mxu0 %v2240_v55 }
  0x97   : > { %2054 = vmatmul.mubr.bf16.gmra.mrb[4].mxu1 %v570_v44  ;;  %v1939_v44 = vunpack.c.l.bf16 %v1938_v40 }
  0x98   : > { %2057 = vmatprep.mubr.bf16.mxu1 %v571_v45 }
  0x9f   : > { %2058 = vmatmul.mubr.bf16.gmra.mrb[8].mxu1 %v572_v50  ;;  %v1944_v50 = vunpack.c.h.bf16 %v1969_v39 }
  0xa0   : > { %2061 = vmatprep.mubr.bf16.mxu1 %v573_v51 }
  0xa7   : > { %2062 = vmatmul.mubr.bf16.gmra.mrb[12].mxu1 %v574_v54 }
  0xa8   : > { %2081 = vmatprep.mubr.msk.bf16.mxu1 %vm2490_vm0, %v2489_v56 }
 0x162   : > { %v2051_v58 = vpop.f32.mrb[0].mxu1 }
 0x163   : > { %v673_v59 = vpop.f32.mrb[1].mxu1 }
 0x164   : > { %v2052_v60 = vpop.f32.mrb[2].mxu1 }
 0x165   : > { %v737_v61 = vpack.c.bf16 %v2052_v60, %v2051_v58  ;;  %v676_v62 = vpop.f32.mrb[3].mxu1  ;;  %v1971_v60 = vld [vmem:[%s2700_s1 + $0x18] sm:$0xff]  }
 0x166   : > { %v736_v63 = vpack.c.bf16 %v676_v62, %v673_v59 }
 0x168   : > { %2066 = vmatpush3.bf16.xpose.msra.mxu1 %v736_v63  ;;  %2101 = vmatprep.mubr.bf16.mxu0 %v736_v63 }
 0x169   : > { %2117 = vmatprep.subr.bf16.mxu0 %v736_v63  ;;  %2102 = vmatmul.mubr.bf16.vlgmr.msra.gmra.mrb[0].mxu0 %v737_v61 }
 0x16a   : > { %2118 = vmatpush3.bf16.msra.mxu0 %v736_v63  ;;  %v2055_v0 = vpop.f32.mrb[4].mxu1  ;;  %2067 = vmatprep.subr.bf16.mxu1 %v2489_v56 }
 0x16b   : > { %2119 = vmatprep.subr.bf16.mxu0 %v737_v61  ;;  %v689_v1 = vpop.f32.mrb[5].mxu1 }
 0x16c   : > { %v2056_v2 = vpop.f32.mrb[6].mxu1 }
 0x16d   : > { %v739_v3 = vpack.c.bf16 %v2056_v2, %v2055_v0  ;;  %v692_v4 = vpop.f32.mrb[7].mxu1  ;;  %v1948_v0 = vunpack.c.h.bf16 %v1970_v57  ;;  %v1951_v2 = vunpack.c.l.bf16 %v1971_v60 }
 0x16e   : > { %v738_v5 = vpack.c.bf16 %v692_v4, %v689_v1  ;;  %2120 = vmatpush3.bf16.msra.mxu0 %v737_v61 }
 0x170   : > { %2068 = vmatpush3.bf16.xpose.msra.mxu1 %v737_v61  ;;  %2105 = vmatprep.mubr.bf16.mxu0 %v738_v5 }
 0x171   : > { %2121 = vmatprep.subr.bf16.mxu0 %v738_v5  ;;  %2106 = vmatmul.mubr.bf16.gmra.mrb[4].mxu0 %v739_v3 }
 0x172   : > { %2122 = vmatpush3.bf16.msra.mxu0 %v738_v5  ;;  %v2059_v6 = vpop.f32.mrb[8].mxu1  ;;  %2069 = vmatprep.subr.bf16.mxu1 %v2489_v56 }
 0x173   : > { %2123 = vmatprep.subr.bf16.mxu0 %v739_v3  ;;  %v705_v7 = vpop.f32.mrb[9].mxu1 }
 0x174   : > { %v2060_v8 = vpop.f32.mrb[10].mxu1 }
 0x175   : > { %v741_v9 = vpack.c.bf16 %v2060_v8, %v2059_v6  ;;  %v708_v10 = vpop.f32.mrb[11].mxu1 }
 0x176   : > { %v740_v11 = vpack.c.bf16 %v708_v10, %v705_v7  ;;  %2124 = vmatpush3.bf16.msra.mxu0 %v739_v3 }
 0x178   : > { %2070 = vmatpush3.bf16.xpose.msra.mxu1 %v738_v5  ;;  %2109 = vmatprep.mubr.bf16.mxu0 %v740_v11  ;;  %v1947_v5 = vunpack.c.l.bf16 %v1970_v57 }
 0x179   : > { %2125 = vmatprep.subr.bf16.mxu0 %v740_v11  ;;  %2110 = vmatmul.mubr.bf16.gmra.mrb[8].mxu0 %v741_v9 }
 0x17a   : > { %2126 = vmatpush3.bf16.msra.mxu0 %v740_v11  ;;  %v2063_v12 = vpop.f32.mrb[12].mxu1  ;;  %2071 = vmatprep.subr.bf16.mxu1 %v2489_v56 }
 0x17b   : > { %2127 = vmatprep.subr.bf16.mxu0 %v741_v9  ;;  %v721_v13 = vpop.f32.mrb[13].mxu1 }
 0x17c   : > { %v2064_v14 = vpop.f32.mrb[14].mxu1 }
 0x17d   : > { %v743_v15 = vpack.c.bf16 %v2064_v14, %v2063_v12  ;;  %v724_v16 = vpop.f32.mrb[15].mxu1 }
 0x17e   : > { %v742_v17 = vpack.c.bf16 %v724_v16, %v721_v13  ;;  %2128 = vmatpush3.bf16.msra.mxu0 %v741_v9  ;;  %v1952_v13 = vunpack.c.h.bf16 %v1971_v60  ;;  %v1972_v16 = vld [vmem:[%s2700_s1 + $0x20] sm:$0xff]  }
 0x180   : > { %2072 = vmatpush3.bf16.xpose.msra.mxu1 %v739_v3  ;;  %2113 = vmatprep.mubr.bf16.mxu0 %v742_v17 }
 0x181   : > { %2129 = vmatprep.subr.bf16.mxu0 %v742_v17  ;;  %2114 = vmatmul.mubr.bf16.gmra.mrb[12].mxu0 %v743_v15 }
 0x182   : > { %2130 = vmatpush3.bf16.msra.mxu0 %v742_v17  ;;  %2073 = vmatprep.subr.bf16.mxu1 %v2489_v56 }
 0x183   : > { %2131 = vmatprep.subr.bf16.mxu0 %v743_v15 }
 0x186   : > { %2132 = vmatpush3.bf16.msra.mxu0 %v743_v15 }
 0x188   : > { %2074 = vmatpush3.bf16.xpose.msra.mxu1 %v740_v11 }
 0x189   : > { %2075 = vmatprep.subr.bf16.mxu1 %v2489_v56 }
 0x190   : > { %2076 = vmatpush3.bf16.xpose.msra.mxu1 %v741_v9 }
 0x191   : > { %2077 = vmatprep.subr.bf16.mxu1 %v2489_v56 }
 0x198   : > { %2078 = vmatpush3.bf16.xpose.msra.mxu1 %v742_v17 }
 0x199   : > { %2079 = vmatprep.subr.bf16.mxu1 %v2489_v56 }
 0x1a0   : > { %2080 = vmatpush3.bf16.xpose.msra.mxu1 %v743_v15 }
 0x1a7   : > { %2082 = vmatmul.mubr.bf16.vlgmr.msra.gmra.mrb[16].mxu1 %v752_v18 }
 0x23c   : > { %v2103_v19 = vpop.f32.mrb[0].mxu0 }
 0x23d   : > { %981 = vperm.xlu1 %2223, %v2103_v19   ;;  %v905_v20 = vpop.f32.mrb[1].mxu0  ;;  %v1973_v19 = vld [vmem:[%s2700_s1 + $0x28] sm:$0xff]  }
 0x23e   : > { %971 = vperm.xlu0 %2224, %v905_v20   ;;  %v2104_v21 = vpop.f32.mrb[2].mxu0 }
 0x23f   : > { %v908_v22 = vpop.f32.mrb[3].mxu0 }
 0x241   : > { %986 = vperm.xlu1 %2223, %v2104_v21  }
 0x242   : > { %976 = vperm.xlu0 %2224, %v908_v22  }
 0x244   : > { %v2107_v23 = vpop.f32.mrb[4].mxu0 }
 0x245   : > { %v921_v24 = vpop.f32.mrb[5].mxu0 }
 0x246   : > { %1001 = vperm.xlu0 %2224, %v2107_v23   ;;  %v2108_v25 = vpop.f32.mrb[6].mxu0 }
 0x247   : > { %v924_v26 = vpop.f32.mrb[7].mxu0 }
 0x248   : > { %996 = vperm.xlu1 %2223, %v924_v26   ;;  %v1959_v26 = vunpack.c.l.bf16 %v1973_v19 }
 0x24a   : > { %991 = vperm.xlu0 %2224, %v921_v24   ;;  %v1956_v24 = vunpack.c.h.bf16 %v1972_v16 }
 0x24c   : > { %1006 = vperm.xlu1 %2223, %v2108_v25   ;;  %v2111_v27 = vpop.f32.mrb[8].mxu0 }
 0x24d   : > { %v937_v28 = vpop.f32.mrb[9].mxu0 }
 0x24e   : > { %1021 = vperm.xlu0 %2224, %v2111_v27   ;;  %v2112_v29 = vpop.f32.mrb[10].mxu0 }
 0x24f   : > { %v940_v30 = vpop.f32.mrb[11].mxu0 }
 0x250   : > { %1016 = vperm.xlu1 %2223, %v940_v30  }
 0x252   : > { %1011 = vperm.xlu0 %2224, %v937_v28  }
 0x254   : > { %1026 = vperm.xlu1 %2223, %v2112_v29   ;;  %v2115_v31 = vpop.f32.mrb[12].mxu0  ;;  %v1955_v29 = vunpack.c.l.bf16 %v1972_v16 }
 0x255   : > { %v953_v32 = vpop.f32.mrb[13].mxu0 }
 0x256   : > { %1041 = vperm.xlu0 %2224, %v2115_v31   ;;  %v2116_v33 = vpop.f32.mrb[14].mxu0 }
 0x257   : > { %v956_v34 = vpop.f32.mrb[15].mxu0 }
 0x258   : > { %1036 = vperm.xlu1 %2223, %v956_v34  }
 0x25a   : > { %1031 = vperm.xlu0 %2224, %v953_v32  }
 0x25c   : > { %1046 = vperm.xlu1 %2223, %v2116_v33  }
 0x27a   : > { %v787_v35 = vpop.f32.mrb[16].mxu1 }
 0x27b   : > { %793 = vst [vmem:[#allocation4] sm:$0x1] %v787_v35  ;;  %v2083_v36 = vpop.f32.mrb[17].mxu1 }
 0x27c   : > { %v790_v37 = vpop.f32.mrb[18].mxu1 }
 0x27d   : > { %v2084_v38 = vpop.f32.mrb[19].mxu1 }
 0x27e   : > { %v1960_v38 = vunpack.c.h.bf16 %v1973_v19 }
 0x282   : > { %v2823_v41 = vld [vmem:[#allocation4] ss:$0 sm:$0xff] }
 0x2bc   : > { %v982_v43 = vpop.permute.xlu1 %981 }
 0x2bd   : > { %v1057_v45 = vadd.f32 %v2823_v41, %v982_v43  ;;  %v972_v46 = vpop.permute.xlu0 %971  ;;  %v1974_v43 = vld [vmem:[%s2700_s1 + $0x30] sm:$0xff]  }
 0x2be   : > { %v1055_v47 = vadd.f32 %v2823_v41, %v972_v46  ;;  %v1975_v46 = vld [vmem:[%s2700_s1 + $0x38] sm:$0xff]  }
 0x2bf   : > { %v1105_v48 = vadd.f32 %v1943_v42, %v1057_v45 }
 0x2c0   : > { %v1103_v49 = vadd.f32 %v1939_v44, %v1055_v47  ;;  %v987_v51 = vpop.permute.xlu1 %986 }
 0x2c1   : > { %v1058_v53 = vadd.f32 %v2823_v41, %v987_v51  ;;  %v977_v54 = vpop.permute.xlu0 %976  ;;  %v1137_v62 = vmul.f32 0.2, %v1105_v48  ;;  %vm1121_vm2 = vcmp.ge.f32.partialorder %v1105_v48, 0.0  ;;  %v1964_v51 = vunpack.c.h.bf16 %v1974_v43 }
 0x2c2   : > { %v1056_v55 = vadd.f32 %v2823_v41, %v977_v54  ;;  %vm1119_vm1 = vcmp.ge.f32.partialorder %v1103_v49, 0.0  ;;  %v1135_v56 = vmul.f32 0.2, %v1103_v49 }
 0x2c3   : > { %v1106_v58 = vadd.f32 %v1944_v50, %v1058_v53  ;;  %v2838_v8 = vsel %vm1121_vm2, %v1105_v48, %v1137_v62  ;;  %v1967_v53 = vunpack.c.l.bf16 %v1975_v46 }
 0x2c4   : > { %v1104_v59 = vadd.f32 %v1940_v52, %v1056_v55  ;;  %v2831_v61 = vsel %vm1119_vm1, %v1103_v49, %v1135_v56  ;;  %v1963_v56 = vunpack.c.l.bf16 %v1974_v43 }
 0x2c5   : > { %v1002_v63 = vpop.permute.xlu0 %1001  ;;  %1167 = vmax.xlane.f32.xlu0 %v2831_v61  ;;  %v1138_v9 = vmul.f32 0.2, %v1106_v58  ;;  %vm1122_vm4 = vcmp.ge.f32.partialorder %v1106_v58, 0.0 }
 0x2c6   : > { %vm1120_vm3 = vcmp.ge.f32.partialorder %v1104_v59, 0.0  ;;  %v1136_v1 = vmul.f32 0.2, %v1104_v59  ;;  %v1061_v3 = vadd.f32 %v2823_v41, %v1002_v63 }
 0x2c7   : > { %v997_v4 = vpop.permute.xlu1 %996  ;;  %v2846_v20 = vsel %vm1122_vm4, %v1106_v58, %v1138_v9 }
 0x2c8   : > { %v1060_v6 = vadd.f32 %v2823_v41, %v997_v4  ;;  %v2836_v7 = vsel %vm1120_vm3, %v1104_v59, %v1136_v1  ;;  %v1109_v14 = vadd.f32 %v1951_v2, %v1061_v3  ;;  %v1968_v2 = vunpack.c.h.bf16 %v1975_v46 }
 0x2c9   : > { %v992_v10 = vpop.permute.xlu0 %991  ;;  %1169 = vmax.xlane.f32.xlu1 %v2836_v7  ;;  %1171 = vmax.xlane.f32.xlu0 %v2838_v8 }
 0x2ca   : > { %v1108_v11 = vadd.f32 %v1948_v0, %v1060_v6  ;;  %v1059_v12 = vadd.f32 %v2823_v41, %v992_v10  ;;  %v1141_v30 = vmul.f32 0.2, %v1109_v14  ;;  %vm1125_vm7 = vcmp.ge.f32.partialorder %v1109_v14, 0.0 }
 0x2cb   : > { %v1007_v15 = vpop.permute.xlu1 %1006 }
 0x2cc   : > { %v1107_v17 = vadd.f32 %v1947_v5, %v1059_v12  ;;  %v1062_v18 = vadd.f32 %v2823_v41, %v1007_v15  ;;  %v1140_v21 = vmul.f32 0.2, %v1108_v11  ;;  %vm1124_vm5 = vcmp.ge.f32.partialorder %v1108_v11, 0.0 }
 0x2cd   : > { %v1022_v22 = vpop.permute.xlu0 %1021  ;;  %1173 = vmax.xlane.f32.xlu0 %v2846_v20  ;;  %v2858_v42 = vsel %vm1125_vm7, %v1109_v14, %v1141_v30 }
 0x2ce   : > { %v1110_v23 = vadd.f32 %v1952_v13, %v1062_v18  ;;  %vm1123_vm6 = vcmp.ge.f32.partialorder %v1107_v17, 0.0  ;;  %v1139_v25 = vmul.f32 0.2, %v1107_v17  ;;  %v1065_v27 = vadd.f32 %v2823_v41, %v1022_v22 }
 0x2cf   : > { %v1017_v28 = vpop.permute.xlu1 %1016  ;;  %v2853_v33 = vsel %vm1124_vm5, %v1108_v11, %v1140_v21 }
 0x2d0   : > { %v1064_v31 = vadd.f32 %v2823_v41, %v1017_v28  ;;  %v2851_v32 = vsel %vm1123_vm6, %v1107_v17, %v1139_v25  ;;  %vm1126_vm8 = vcmp.ge.f32.partialorder %v1110_v23, 0.0  ;;  %v1142_v35 = vmul.f32 0.2, %v1110_v23 }
 0x2d1   : > { %v1012_v34 = vpop.permute.xlu0 %1011  ;;  %1175 = vmax.xlane.f32.xlu1 %v2851_v32  ;;  %1177 = vmax.xlane.f32.xlu0 %v2853_v33  ;;  %v1113_v39 = vadd.f32 %v1959_v26, %v1065_v27 }
 0x2d2   : > { %v1112_v36 = vadd.f32 %v1956_v24, %v1064_v31  ;;  %v1063_v37 = vadd.f32 %v2823_v41, %v1012_v34  ;;  %v2863_v47 = vsel %vm1126_vm8, %v1110_v23, %v1142_v35 }
 0x2d3   : > { %v1027_v40 = vpop.permute.xlu1 %1026  ;;  %v1145_v57 = vmul.f32 0.2, %v1113_v39  ;;  %vm1129_vm11 = vcmp.ge.f32.partialorder %v1113_v39, 0.0 }
 0x2d4   : > { %v1111_v44 = vadd.f32 %v1955_v29, %v1063_v37  ;;  %v1066_v45 = vadd.f32 %v2823_v41, %v1027_v40  ;;  %v1144_v48 = vmul.f32 0.2, %v1112_v36  ;;  %vm1128_vm9 = vcmp.ge.f32.partialorder %v1112_v36, 0.0 }
 0x2d5   : > { %v1042_v49 = vpop.permute.xlu0 %1041  ;;  %1179 = vmax.xlane.f32.xlu1 %v2858_v42  ;;  %1181 = vmax.xlane.f32.xlu0 %v2863_v47  ;;  %v2876_v5 = vsel %vm1129_vm11, %v1113_v39, %v1145_v57 }
 0x2d6   : > { %v1114_v50 = vadd.f32 %v1960_v38, %v1066_v45  ;;  %vm1127_vm10 = vcmp.ge.f32.partialorder %v1111_v44, 0.0  ;;  %v1143_v52 = vmul.f32 0.2, %v1111_v44  ;;  %v1069_v54 = vadd.f32 %v2823_v41, %v1042_v49 }
 0x2d7   : > { %v1037_v55 = vpop.permute.xlu1 %1036  ;;  %v2871_v60 = vsel %vm1128_vm9, %v1112_v36, %v1144_v48 }
 0x2d8   : > { %v1068_v58 = vadd.f32 %v2823_v41, %v1037_v55  ;;  %v2869_v59 = vsel %vm1127_vm10, %v1111_v44, %v1143_v52  ;;  %vm1130_vm12 = vcmp.ge.f32.partialorder %v1114_v50, 0.0  ;;  %v1146_v63 = vmul.f32 0.2, %v1114_v50 }
 0x2d9   : > { %v1032_v62 = vpop.permute.xlu0 %1031  ;;  %1183 = vmax.xlane.f32.xlu1 %v2869_v59  ;;  %1185 = vmax.xlane.f32.xlu0 %v2871_v60  ;;  %v1117_v3 = vadd.f32 %v1967_v53, %v1069_v54 }
 0x2da   : > { %v1116_v0 = vadd.f32 %v1964_v51, %v1068_v58  ;;  %v1067_v1 = vadd.f32 %v2823_v41, %v1032_v62  ;;  %v2879_v10 = vsel %vm1130_vm12, %v1114_v50, %v1146_v63 }
 0x2db   : > { %v1047_v4 = vpop.permute.xlu1 %1046  ;;  %v1149_v16 = vmul.f32 0.2, %v1117_v3  ;;  %vm1133_vm15 = vcmp.ge.f32.partialorder %v1117_v3, 0.0 }
 0x2dc   : > { %v1115_v6 = vadd.f32 %v1963_v56, %v1067_v1  ;;  %v1070_v9 = vadd.f32 %v2823_v41, %v1047_v4  ;;  %v1148_v11 = vmul.f32 0.2, %v1116_v0  ;;  %vm1132_vm13 = vcmp.ge.f32.partialorder %v1116_v0, 0.0 }
 0x2dd   : > { %1187 = vmax.xlane.f32.xlu1 %v2876_v5  ;;  %1189 = vmax.xlane.f32.xlu0 %v2879_v10  ;;  %v2889_v41 = vsel %vm1133_vm15, %v1117_v3, %v1149_v16 }
 0x2de   : > { %v1118_v12 = vadd.f32 %v1968_v2, %v1070_v9  ;;  %vm1131_vm14 = vcmp.ge.f32.partialorder %v1115_v6, 0.0  ;;  %v1147_v13 = vmul.f32 0.2, %v1115_v6  ;;  %v2885_v15 = vsel %vm1132_vm13, %v1116_v0, %v1148_v11 }
 0x2e0   : > { %v2883_v14 = vsel %vm1131_vm14, %v1115_v6, %v1147_v13  ;;  %v1150_v17 = vmul.f32 0.2, %v1118_v12  ;;  %vm1134_vm0 = vcmp.ge.f32.partialorder %v1118_v12, 0.0 }
 0x2e1   : > { %1191 = vmax.xlane.f32.xlu1 %v2883_v14  ;;  %1193 = vmax.xlane.f32.xlu0 %v2885_v15 }
 0x2e2   : > { %v2891_v18 = vsel %vm1134_vm0, %v1118_v12, %v1150_v17 }
 0x2e5   : > { %1195 = vmax.xlane.f32.xlu1 %v2889_v41  ;;  %1197 = vmax.xlane.f32.xlu0 %v2891_v18 }
 0x352   : > { %v1168_v19 = vpop.xlane.xlu0 %1167 }
 0x353   : > { %v1199_v21 = vsub.f32 %v2831_v61, %v1168_v19 }
 0x355   : > { %v1215_v22 = vmul.f32 1.442695, %v1199_v21 }
 0x356   : > { %v1170_v23 = vpop.xlane.xlu1 %1169  ;;  %v1172_v24 = vpop.xlane.xlu0 %1171 }
 0x357   : > { %v1200_v25 = vsub.f32 %v2836_v7, %v1170_v23  ;;  %v1201_v26 = vsub.f32 %v2838_v8, %v1172_v24  ;;  %2241 = vpow2.f32 %v1215_v22 }
 0x359   : > { %v1217_v27 = vmul.f32 1.442695, %v1200_v25  ;;  %v1219_v28 = vmul.f32 1.442695, %v1201_v26 }
 0x35a   : > { %v1174_v29 = vpop.xlane.xlu0 %1173 }
 0x35b   : > { %2243 = vpow2.f32 %v1217_v27  ;;  %v1202_v30 = vsub.f32 %v2846_v20, %v1174_v29 }
 0x35c   : > { %2245 = vpow2.f32 %v1219_v28 }
 0x35d   : > { %v1221_v31 = vmul.f32 1.442695, %v1202_v30 }
 0x35e   : > { %v1176_v34 = vpop.xlane.xlu1 %1175  ;;  %v1178_v35 = vpop.xlane.xlu0 %1177 }
 0x35f   : > { %2247 = vpow2.f32 %v1221_v31  ;;  %v1203_v61 = vsub.f32 %v2851_v32, %v1176_v34  ;;  %v1204_v36 = vsub.f32 %v2853_v33, %v1178_v35 }
 0x361   : > { %v1223_v37 = vmul.f32 1.442695, %v1203_v61  ;;  %v1225_v7 = vmul.f32 1.442695, %v1204_v36  ;;  %v2242_v43 = vpop.eup %2241 }
 0x362   : > { %v1180_v38 = vpop.xlane.xlu1 %1179  ;;  %v1182_v8 = vpop.xlane.xlu0 %1181 }
 0x363   : > { %2249 = vpow2.f32 %v1223_v37  ;;  %v1205_v39 = vsub.f32 %v2858_v42, %v1180_v38  ;;  %v1206_v40 = vsub.f32 %v2863_v47, %v1182_v8 }
 0x364   : > { %2251 = vpow2.f32 %v1225_v7 }
 0x365   : > { %v2244_v20 = vpop.eup %2243  ;;  %v1227_v44 = vmul.f32 1.442695, %v1205_v39  ;;  %v1229_v45 = vmul.f32 1.442695, %v1206_v40  ;;  %v2916_v40 = vld [vmem:[%s455_s29] ss:$0 sm:$0xff] }
 0x366   : > { %v2246_v46 = vpop.eup %2245  ;;  %v1184_v48 = vpop.xlane.xlu1 %1183  ;;  %v1279_v32 = vpack.c.bf16 %v2244_v20, %v2242_v43 }
 0x367   : > { %v1186_v49 = vpop.xlane.xlu0 %1185  ;;  %2253 = vpow2.f32 %v1227_v44  ;;  %v1207_v33 = vsub.f32 %v2869_v59, %v1184_v48  ;;  %1251 = vadd.xlane.f32.xlu1 %v2246_v46 }
 0x368   : > { %v1208_v50 = vsub.f32 %v2871_v60, %v1186_v49  ;;  %2255 = vpow2.f32 %v1229_v45  ;;  %2133 = vmatprep.mubr.bf16.mxu0 %v1279_v32 }
 0x369   : > { %v2248_v42 = vpop.eup %2247  ;;  %v1231_v51 = vmul.f32 1.442695, %v1207_v33 }
 0x36a   : > { %v1233_v47 = vmul.f32 1.442695, %v1208_v50  ;;  %v1188_v52 = vpop.xlane.xlu1 %1187  ;;  %1253 = vadd.xlane.f32.xlu0 %v2248_v42  ;;  %v1280_v54 = vpack.c.bf16 %v2248_v42, %v2246_v46 }
 0x36b   : > { %v1190_v53 = vpop.xlane.xlu0 %1189  ;;  %2257 = vpow2.f32 %v1231_v51  ;;  %v1209_v55 = vsub.f32 %v2876_v5, %v1188_v52  ;;  %1247 = vadd.xlane.f32.xlu1 %v2242_v43  ;;  %v2929_v52 = vld [vmem:[%s464_s24] ss:$0 sm:$0xff] }
 0x36c   : > { %v1210_v56 = vsub.f32 %v2879_v10, %v1190_v53  ;;  %2259 = vpow2.f32 %v1233_v47  ;;  %2134 = vmatmul.mubr.bf16.vlgmr.msra.gmra.mrb[16].mxu0 %v1280_v54 }
 0x36d   : > { %v2250_v57 = vpop.eup %2249  ;;  %v1235_v58 = vmul.f32 1.442695, %v1209_v55 }
 0x36e   : > { %v1237_v59 = vmul.f32 1.442695, %v1210_v56  ;;  %v2252_v60 = vpop.eup %2251  ;;  %v1192_v62 = vpop.xlane.xlu1 %1191  ;;  %1249 = vadd.xlane.f32.xlu0 %v2244_v20 }
 0x36f   : > { %v1194_v63 = vpop.xlane.xlu0 %1193  ;;  %2261 = vpow2.f32 %v1235_v58  ;;  %v1211_v0 = vsub.f32 %v2883_v14, %v1192_v62  ;;  %v1281_v2 = vpack.c.bf16 %v2252_v60, %v2250_v57 }
 0x370   : > { %v1212_v1 = vsub.f32 %v2885_v15, %v1194_v63  ;;  %2263 = vpow2.f32 %v1237_v59 }
 0x371   : > { %v2254_v3 = vpop.eup %2253  ;;  %v1239_v4 = vmul.f32 1.442695, %v1211_v0  ;;  %2137 = vmatprep.mubr.bf16.mxu0 %v1281_v2 }
 0x372   : > { %v1241_v5 = vmul.f32 1.442695, %v1212_v1  ;;  %v2256_v6 = vpop.eup %2255  ;;  %v1196_v9 = vpop.xlane.xlu1 %1195  ;;  %1259 = vadd.xlane.f32.xlu1 %v2254_v3 }
 0x373   : > { %v1198_v10 = vpop.xlane.xlu0 %1197  ;;  %2265 = vpow2.f32 %v1239_v4  ;;  %v1213_v11 = vsub.f32 %v2889_v41, %v1196_v9  ;;  %1261 = vadd.xlane.f32.xlu0 %v2256_v6  ;;  %v1282_v13 = vpack.c.bf16 %v2256_v6, %v2254_v3 }
 0x374   : > { %v1214_v12 = vsub.f32 %v2891_v18, %v1198_v10  ;;  %2267 = vpow2.f32 %v1241_v5 }
 0x375   : > { %v2258_v14 = vpop.eup %2257  ;;  %v1243_v15 = vmul.f32 1.442695, %v1213_v11  ;;  %2138 = vmatmul.mubr.bf16.gmra.mrb[20].mxu0 %v1282_v13 }
 0x376   : > { %v1245_v16 = vmul.f32 1.442695, %v1214_v12  ;;  %v2260_v17 = vpop.eup %2259  ;;  %1255 = vadd.xlane.f32.xlu1 %v2250_v57 }
 0x377   : > { %2269 = vpow2.f32 %v1243_v15  ;;  %1257 = vadd.xlane.f32.xlu0 %v2252_v60  ;;  %v1283_v19 = vpack.c.bf16 %v2260_v17, %v2258_v14 }
 0x378   : > { %2271 = vpow2.f32 %v1245_v16 }
 0x379   : > { %v2262_v21 = vpop.eup %2261  ;;  %2141 = vmatprep.mubr.bf16.mxu0 %v1283_v19 }
 0x37a   : > { %v2264_v22 = vpop.eup %2263  ;;  %1267 = vadd.xlane.f32.xlu1 %v2262_v21 }
 0x37b   : > { %1269 = vadd.xlane.f32.xlu0 %v2264_v22  ;;  %v1284_v41 = vpack.c.bf16 %v2264_v22, %v2262_v21 }
 0x37d   : > { %v2266_v23 = vpop.eup %2265  ;;  %2142 = vmatmul.mubr.bf16.gmra.mrb[24].mxu0 %v1284_v41 }
 0x37e   : > { %v2268_v18 = vpop.eup %2267  ;;  %1263 = vadd.xlane.f32.xlu1 %v2258_v14 }
 0x37f   : > { %1265 = vadd.xlane.f32.xlu0 %v2260_v17  ;;  %v1285_v24 = vpack.c.bf16 %v2268_v18, %v2266_v23 }
 0x381   : > { %v2270_v25 = vpop.eup %2269  ;;  %2145 = vmatprep.mubr.bf16.mxu0 %v1285_v24 }
 0x382   : > { %v2272_v26 = vpop.eup %2271  ;;  %1271 = vadd.xlane.f32.xlu1 %v2266_v23 }
 0x383   : > { %1273 = vadd.xlane.f32.xlu0 %v2268_v18  ;;  %v1286_v27 = vpack.c.bf16 %v2272_v26, %v2270_v25 }
 0x385   : > { %2146 = vmatmul.mubr.bf16.gmra.mrb[28].mxu0 %v1286_v27 }
 0x386   : > { %1275 = vadd.xlane.f32.xlu1 %v2270_v25 }
 0x387   : > { %1277 = vadd.xlane.f32.xlu0 %v2272_v26 }
 0x3f4   : > { %v1252_v28 = vpop.xlane.xlu1 %1251 }
 0x3f5   : > { %2273 = vrcp.f32 %v1252_v28 }
 0x3f7   : > { %v1254_v29 = vpop.xlane.xlu0 %1253 }
 0x3f8   : > { %v1248_v30 = vpop.xlane.xlu1 %1247 }
 0x3f9   : > { %2275 = vrcp.f32 %v1248_v30 }
 0x3fa   : > { %2277 = vrcp.f32 %v1254_v29 }
 0x3fb   : > { %v1250_v31 = vpop.xlane.xlu0 %1249 }
 0x3fc   : > { %2279 = vrcp.f32 %v1250_v31 }
 0x3ff   : > { %v1260_v34 = vpop.xlane.xlu1 %1259  ;;  %v2274_v38 = vpop.eup %2273 }
 0x400   : > { %v1262_v35 = vpop.xlane.xlu0 %1261  ;;  %2281 = vrcp.f32 %v1260_v34 }
 0x403   : > { %v1256_v61 = vpop.xlane.xlu1 %1255  ;;  %v2276_v43 = vpop.eup %2275 }
 0x404   : > { %v1258_v36 = vpop.xlane.xlu0 %1257  ;;  %2283 = vrcp.f32 %v1256_v61  ;;  %v2278_v45 = vpop.eup %2277 }
 0x405   : > { %2285 = vrcp.f32 %v1262_v35 }
 0x406   : > { %2287 = vrcp.f32 %v1258_v36  ;;  %v2280_v32 = vpop.eup %2279 }
 0x407   : > { %v1268_v37 = vpop.xlane.xlu1 %1267 }
 0x408   : > { %v1270_v7 = vpop.xlane.xlu0 %1269  ;;  %2289 = vrcp.f32 %v1268_v37 }
 0x40a   : > { %v2282_v62 = vpop.eup %2281 }
 0x40b   : > { %v1264_v8 = vpop.xlane.xlu1 %1263 }
 0x40c   : > { %v1266_v46 = vpop.xlane.xlu0 %1265  ;;  %2291 = vrcp.f32 %v1264_v8 }
 0x40d   : > { %2293 = vrcp.f32 %v1270_v7 }
 0x40e   : > { %v2284_v2 = vpop.eup %2283  ;;  %2295 = vrcp.f32 %v1266_v46 }
 0x40f   : > { %v1272_v55 = vpop.xlane.xlu1 %1271  ;;  %v2286_v5 = vpop.eup %2285 }
 0x410   : > { %v1274_v60 = vpop.xlane.xlu0 %1273  ;;  %v2288_v11 = vpop.eup %2287 }
 0x412   : > { %v2290_v26 = vpop.eup %2289 }
 0x413   : > { %v1276_v12 = vpop.xlane.xlu1 %1275 }
 0x414   : > { %v1278_v21 = vpop.xlane.xlu0 %1277  ;;  %2297 = vrcp.f32 %v1276_v12 }
 0x415   : > { %2299 = vrcp.f32 %v1272_v55 }
 0x416   : > { %2301 = vrcp.f32 %v1278_v21  ;;  %v2292_v28 = vpop.eup %2291 }
 0x417   : > { %2303 = vrcp.f32 %v1274_v60  ;;  %v2294_v35 = vpop.eup %2293 }
 0x418   : > { %v2296_v37 = vpop.eup %2295 }
 0x43f   : > { %v2135_v39 = vpop.f32.mrb[16].mxu0 }
 0x440   : > { %v1410_v20 = vmul.f32 %v2274_v38, %v2135_v39  ;;  %v1329_v44 = vpop.f32.mrb[17].mxu0 }
 0x441   : > { %v1408_v48 = vmul.f32 %v2276_v43, %v1329_v44  ;;  %v2136_v49 = vpop.f32.mrb[18].mxu0 }
 0x442   : > { %v2919_v33 = vadd.f32 %v2916_v40, %v1410_v20  ;;  %v1411_v50 = vmul.f32 %v2278_v45, %v2136_v49  ;;  %v1332_v42 = vpop.f32.mrb[19].mxu0 }
 0x443   : > { %v2922_v51 = vadd.f32 %v2916_v40, %v1408_v48  ;;  %v1409_v47 = vmul.f32 %v2280_v32, %v1332_v42  ;;  %v2298_v42 = vpop.eup %2297 }
 0x444   : > { %v1449_v53 = vmax.f32 %v2919_v33, 0.0  ;;  %v2933_v54 = vadd.f32 %v2916_v40, %v1411_v50  ;;  %v2300_v55 = vpop.eup %2299 }
 0x445   : > { %v2936_v56 = vadd.f32 %v2916_v40, %v1409_v47  ;;  %v1447_v57 = vmax.f32 %v2922_v51, 0.0 }
 0x446   : > { %v1450_v58 = vmax.f32 %v2933_v54, 0.0  ;;  %v1472_v59 = vmul.f32 %v2929_v52, %v1449_v53 }
 0x447   : > { %v1448_v63 = vmax.f32 %v2936_v56, 0.0  ;;  %v1470_v10 = vmul.f32 %v2929_v52, %v1447_v57 }
 0x448   : > { %v2139_v0 = vpop.f32.mrb[20].mxu0  ;;  %1490 = vadd.xlane.f32.xlu1 %v1472_v59  ;;  %v1473_v1 = vmul.f32 %v2929_v52, %v1450_v58 }
 0x449   : > { %v1414_v3 = vmul.f32 %v2282_v62, %v2139_v0  ;;  %v1345_v4 = vpop.f32.mrb[21].mxu0  ;;  %v1471_v19 = vmul.f32 %v2929_v52, %v1448_v63 }
 0x44a   : > { %v1412_v6 = vmul.f32 %v2284_v2, %v1345_v4  ;;  %v2140_v9 = vpop.f32.mrb[22].mxu0  ;;  %1492 = vadd.xlane.f32.xlu0 %v1473_v1  ;;  %v2302_v1 = vpop.eup %2301 }
 0x44b   : > { %v2951_v13 = vadd.f32 %v2916_v40, %v1414_v3  ;;  %v1415_v14 = vmul.f32 %v2286_v5, %v2140_v9  ;;  %v1348_v15 = vpop.f32.mrb[23].mxu0  ;;  %v2304_v4 = vpop.eup %2303 }
 0x44c   : > { %v2954_v16 = vadd.f32 %v2916_v40, %v1412_v6  ;;  %v1413_v17 = vmul.f32 %v2288_v11, %v1348_v15  ;;  %1486 = vadd.xlane.f32.xlu1 %v1470_v10 }
 0x44d   : > { %v1453_v22 = vmax.f32 %v2951_v13, 0.0  ;;  %v2961_v41 = vadd.f32 %v2916_v40, %v1415_v14 }
 0x44e   : > { %v2964_v23 = vadd.f32 %v2916_v40, %v1413_v17  ;;  %1488 = vadd.xlane.f32.xlu0 %v1471_v19  ;;  %v1451_v18 = vmax.f32 %v2954_v16, 0.0 }
 0x44f   : > { %v1454_v24 = vmax.f32 %v2961_v41, 0.0  ;;  %v1476_v25 = vmul.f32 %v2929_v52, %v1453_v22 }
 0x450   : > { %v2143_v27 = vpop.f32.mrb[24].mxu0  ;;  %v1452_v29 = vmax.f32 %v2964_v23, 0.0  ;;  %v1474_v39 = vmul.f32 %v2929_v52, %v1451_v18 }
 0x451   : > { %v1418_v30 = vmul.f32 %v2290_v26, %v2143_v27  ;;  %1498 = vadd.xlane.f32.xlu1 %v1476_v25  ;;  %v1361_v31 = vpop.f32.mrb[25].mxu0  ;;  %v1477_v34 = vmul.f32 %v2929_v52, %v1454_v24 }
 0x452   : > { %v1416_v61 = vmul.f32 %v2292_v28, %v1361_v31  ;;  %v2144_v36 = vpop.f32.mrb[26].mxu0  ;;  %v1475_v46 = vmul.f32 %v2929_v52, %v1452_v29 }
 0x453   : > { %v2976_v7 = vadd.f32 %v2916_v40, %v1418_v30  ;;  %v1419_v38 = vmul.f32 %v2294_v35, %v2144_v36  ;;  %v1364_v8 = vpop.f32.mrb[27].mxu0  ;;  %1500 = vadd.xlane.f32.xlu0 %v1477_v34 }
 0x454   : > { %v2982_v43 = vadd.f32 %v2916_v40, %v1416_v61  ;;  %v1417_v20 = vmul.f32 %v2296_v37, %v1364_v8 }
 0x455   : > { %v1457_v44 = vmax.f32 %v2976_v7, 0.0  ;;  %v2986_v45 = vadd.f32 %v2916_v40, %v1419_v38  ;;  %1494 = vadd.xlane.f32.xlu1 %v1474_v39 }
 0x456   : > { %v2992_v48 = vadd.f32 %v2916_v40, %v1417_v20  ;;  %v1455_v49 = vmax.f32 %v2982_v43, 0.0 }
 0x457   : > { %v1458_v32 = vmax.f32 %v2986_v45, 0.0  ;;  %1496 = vadd.xlane.f32.xlu0 %v1475_v46  ;;  %v1480_v50 = vmul.f32 %v2929_v52, %v1457_v44 }
 0x458   : > { %v2147_v47 = vpop.f32.mrb[28].mxu0  ;;  %v1456_v59 = vmax.f32 %v2992_v48, 0.0  ;;  %v1478_v9 = vmul.f32 %v2929_v52, %v1455_v49 }
 0x459   : > { %v1422_v60 = vmul.f32 %v2298_v42, %v2147_v47  ;;  %1506 = vadd.xlane.f32.xlu1 %v1480_v50  ;;  %v1377_v62 = vpop.f32.mrb[29].mxu0  ;;  %v1481_v0 = vmul.f32 %v2929_v52, %v1458_v32 }
 0x45a   : > { %v1420_v2 = vmul.f32 %v2300_v55, %v1377_v62  ;;  %v2148_v3 = vpop.f32.mrb[30].mxu0  ;;  %v1479_v14 = vmul.f32 %v2929_v52, %v1456_v59 }
 0x45b   : > { %v1423_v5 = vmul.f32 %v2302_v1, %v2148_v3  ;;  %v1380_v6 = vpop.f32.mrb[31].mxu0  ;;  %1508 = vadd.xlane.f32.xlu0 %v1481_v0  ;;  %v3007_v10 = vadd.f32 %v2916_v40, %v1422_v60 }
 0x45c   : > { %v3010_v11 = vadd.f32 %v2916_v40, %v1420_v2  ;;  %v1421_v12 = vmul.f32 %v2304_v4, %v1380_v6 }
 0x45d   : > { %1502 = vadd.xlane.f32.xlu1 %v1478_v9  ;;  %v3017_v17 = vadd.f32 %v2916_v40, %v1423_v5  ;;  %v1461_v21 = vmax.f32 %v3007_v10, 0.0 }
 0x45e   : > { %v1459_v15 = vmax.f32 %v3010_v11, 0.0  ;;  %v3020_v19 = vadd.f32 %v2916_v40, %v1421_v12 }
 0x45f   : > { %1504 = vadd.xlane.f32.xlu0 %v1479_v14  ;;  %v1462_v27 = vmax.f32 %v3017_v17, 0.0  ;;  %v1484_v40 = vmul.f32 %v2929_v52, %v1461_v21 }
 0x460   : > { %v1460_v25 = vmax.f32 %v3020_v19, 0.0  ;;  %v1482_v26 = vmul.f32 %v2929_v52, %v1459_v15 }
 0x461   : > { %v1485_v30 = vmul.f32 %v2929_v52, %v1462_v27 }
 0x462   : > { %1510 = vadd.xlane.f32.xlu1 %v1482_v26  ;;  %v1483_v28 = vmul.f32 %v2929_v52, %v1460_v25 }
 0x464   : > { %1512 = vadd.xlane.f32.xlu0 %v1483_v28 }
 0x466   : > { %1514 = vadd.xlane.f32.xlu1 %v1484_v40 }
 0x468   : > { %1516 = vadd.xlane.f32.xlu0 %v1485_v30 }
 0x4d5   : > { %v1491_v31 = vpop.xlane.xlu1 %1490 }
 0x4d6   : > { %v3039_v34 = vsub.f32 %v1449_v53, %v1491_v31 }
 0x4d7   : > { %v1493_v35 = vpop.xlane.xlu0 %1492 }
 0x4d8   : > { %v1536_v61 = vmul.f32 %v3039_v34, %v3039_v34  ;;  %v3045_v36 = vsub.f32 %v1450_v58, %v1493_v35 }
 0x4d9   : > { %v1487_v37 = vpop.xlane.xlu1 %1486 }
 0x4da   : > { %v1537_v38 = vmul.f32 %v3045_v36, %v3045_v36  ;;  %v3051_v8 = vsub.f32 %v1447_v57, %v1487_v37  ;;  %v1552_v33 = vmul.f32 %v2929_v52, %v1536_v61 }
 0x4db   : > { %v1489_v53 = vpop.xlane.xlu0 %1488 }
 0x4dc   : > { %v1534_v39 = vmul.f32 %v3051_v8, %v3051_v8  ;;  %v3058_v20 = vsub.f32 %v1448_v63, %v1489_v53  ;;  %1570 = vadd.xlane.f32.xlu1 %v1552_v33  ;;  %v1553_v54 = vmul.f32 %v2929_v52, %v1537_v38 }
 0x4de   : > { %v1535_v58 = vmul.f32 %v3058_v20, %v3058_v20  ;;  %v1499_v46 = vpop.xlane.xlu1 %1498  ;;  %1572 = vadd.xlane.f32.xlu0 %v1553_v54  ;;  %v1550_v51 = vmul.f32 %v2929_v52, %v1534_v39 }
 0x4df   : > { %v3066_v57 = vsub.f32 %v1453_v22, %v1499_v46 }
 0x4e0   : > { %v1501_v50 = vpop.xlane.xlu0 %1500  ;;  %1566 = vadd.xlane.f32.xlu1 %v1550_v51  ;;  %v1551_v56 = vmul.f32 %v2929_v52, %v1535_v58 }
 0x4e1   : > { %v1540_v63 = vmul.f32 %v3066_v57, %v3066_v57  ;;  %v3073_v42 = vsub.f32 %v1454_v24, %v1501_v50 }
 0x4e2   : > { %v1495_v47 = vpop.xlane.xlu1 %1494  ;;  %1568 = vadd.xlane.f32.xlu0 %v1551_v56  ;;  %v3154_v56 = vld [vmem:[%s458_s25] ss:$0 sm:$0xff]  ;;  %s3287_s25 = sadd.s32 4294967295, %s2483_s14  }
 0x4e3   : > { %v1541_v55 = vmul.f32 %v3073_v42, %v3073_v42  ;;  %v3079_v13 = vsub.f32 %v1451_v18, %v1495_v47  ;;  %v1556_v22 = vmul.f32 %v2929_v52, %v1540_v63  ;;  %p3212_p4 = scmp.eq.s32.totalorder %s3287_s25, 1 }
 0x4e4   : > { %v1497_v60 = vpop.xlane.xlu0 %1496 }
 0x4e5   : > { %v1538_v62 = vmul.f32 %v3079_v13, %v3079_v13  ;;  %v3086_v41 = vsub.f32 %v1452_v29, %v1497_v60  ;;  %1578 = vadd.xlane.f32.xlu1 %v1556_v22  ;;  %v1557_v24 = vmul.f32 %v2929_v52, %v1541_v55  ;;  %v3162_v60 = vld [vmem:[%s461_s13] ss:$0 sm:$0xff]  ;;  %s1734_s13 = sshll.u32 %s2492_s12, 4  ;;  %s1735_s13 = int_to_ptr.vmem [resolvable:$true] %s1734_s13 }
 0x4e6   : > { %v1507_v0 = vpop.xlane.xlu1 %1506  ;;  %s2397_s19 = scalar_lea.vmem %s1735_s13, 2048  ;;  %p2404_p13 = scmp.lt.s32.totalorder %s1735_s13, %s1735_s13 }
 0x4e7   : > { %v1539_v1 = vmul.f32 %v3086_v41, %v3086_v41  ;;  %v3093_v16 = vsub.f32 %v1457_v44, %v1507_v0  ;;  %1580 = vadd.xlane.f32.xlu0 %v1557_v24  ;;  %v1554_v18 = vmul.f32 %v2929_v52, %v1538_v62  ;;  %p2398_p8 = scmp.ne.s32.totalorder %s1735_s13, %s2397_s19  ;;  %p2405_p3 = scmp.lt.s32.totalorder %s2397_s19, %s2397_s19 }
 0x4e8   : > { %v1509_v2 = vpop.xlane.xlu0 %1508 }
 0x4e9   : > { %v1544_v23 = vmul.f32 %v3093_v16, %v3093_v16  ;;  %v3100_v29 = vsub.f32 %v1458_v32, %v1509_v2  ;;  %1574 = vadd.xlane.f32.xlu1 %v1554_v18  ;;  %v1555_v3 = vmul.f32 %v2929_v52, %v1539_v1  ;;  %p2399_p1 = pnand %p2398_p8, %p3212_p4  ;;  %p2406_p5 = por %p2405_p3, %p2404_p13 }
 0x4ea   : > { %v1503_v4 = vpop.xlane.xlu1 %1502 }
 0x4eb   : > { %v1545_v7 = vmul.f32 %v3100_v29, %v3100_v29  ;;  %v3107_v44 = vsub.f32 %v1455_v49, %v1503_v4  ;;  %1576 = vadd.xlane.f32.xlu0 %v1555_v3  ;;  %v1560_v5 = vmul.f32 %v2929_v52, %v1544_v23  ;;  %p2400_p2 = pneg %p2399_p1 }
 0x4ec   : > { %v1505_v6 = vpop.xlane.xlu0 %1504 }
 0x4ed   : > { %v1542_v45 = vmul.f32 %v3107_v44, %v3107_v44  ;;  %v3114_v32 = vsub.f32 %v1456_v59, %v1505_v6  ;;  %1586 = vadd.xlane.f32.xlu1 %v1560_v5  ;;  %v1561_v9 = vmul.f32 %v2929_v52, %v1545_v7  ;;  %p2407_p6 = pnand %p2406_p5, %p2400_p2 }
 0x4ef   : > { %v1543_v12 = vmul.f32 %v3114_v32, %v3114_v32  ;;  %v1511_v43 = vpop.xlane.xlu1 %1510  ;;  %1588 = vadd.xlane.f32.xlu0 %v1561_v9  ;;  %v1558_v49 = vmul.f32 %v2929_v52, %v1542_v45 }
 0x4f0   : > { %v3122_v14 = vsub.f32 %v1459_v15, %v1511_v43 }
 0x4f1   : > { %1582 = vadd.xlane.f32.xlu1 %v1558_v49  ;;  %v1513_v26 = vpop.xlane.xlu0 %1512  ;;  %v1559_v48 = vmul.f32 %v2929_v52, %v1543_v12 }
 0x4f2   : > { %v1546_v59 = vmul.f32 %v3122_v14, %v3122_v14  ;;  %v3129_v28 = vsub.f32 %v1460_v25, %v1513_v26 }
 0x4f3   : > { %v1515_v40 = vpop.xlane.xlu1 %1514  ;;  %1584 = vadd.xlane.f32.xlu0 %v1559_v48 }
 0x4f4   : > { %v1547_v30 = vmul.f32 %v3129_v28, %v3129_v28  ;;  %v3135_v11 = vsub.f32 %v1461_v21, %v1515_v40  ;;  %v1562_v15 = vmul.f32 %v2929_v52, %v1546_v59 }
 0x4f5   : > { %v1517_v31 = vpop.xlane.xlu0 %1516 }
 0x4f6   : > { %v1548_v35 = vmul.f32 %v3135_v11, %v3135_v11  ;;  %v3142_v19 = vsub.f32 %v1462_v27, %v1517_v31  ;;  %1590 = vadd.xlane.f32.xlu1 %v1562_v15  ;;  %v1563_v25 = vmul.f32 %v2929_v52, %v1547_v30 }
 0x4f8   : > { %v1549_v61 = vmul.f32 %v3142_v19, %v3142_v19  ;;  %1592 = vadd.xlane.f32.xlu0 %v1563_v25  ;;  %v1564_v10 = vmul.f32 %v2929_v52, %v1548_v35 }
 0x4fa   : > { %1594 = vadd.xlane.f32.xlu1 %v1564_v10  ;;  %v1565_v21 = vmul.f32 %v2929_v52, %v1549_v61 }
 0x4fc   : > { %1596 = vadd.xlane.f32.xlu0 %v1565_v21 }
 0x569   : > { %v1571_v37 = vpop.xlane.xlu1 %1570 }
 0x56a   : > { %v1600_v38 = vadd.f32 1e-05, %v1571_v37 }
 0x56b   : > { %v1573_v33 = vpop.xlane.xlu0 %1572 }
 0x56c   : > { %2305 = vrsqrt.f32 %v1600_v38  ;;  %v1601_v17 = vadd.f32 1e-05, %v1573_v33 }
 0x56d   : > { %v1567_v27 = vpop.xlane.xlu1 %1566 }
 0x56e   : > { %2307 = vrsqrt.f32 %v1601_v17  ;;  %v1598_v53 = vadd.f32 1e-05, %v1567_v27 }
 0x56f   : > { %v1569_v39 = vpop.xlane.xlu0 %1568 }
 0x570   : > { %2309 = vrsqrt.f32 %v1598_v53  ;;  %v1599_v54 = vadd.f32 1e-05, %v1569_v39 }
 0x572   : > { %2311 = vrsqrt.f32 %v1599_v54  ;;  %v1579_v58 = vpop.xlane.xlu1 %1578 }
 0x573   : > { %v1604_v46 = vadd.f32 1e-05, %v1579_v58 }
 0x574   : > { %v1581_v51 = vpop.xlane.xlu0 %1580 }
 0x575   : > { %2313 = vrsqrt.f32 %v1604_v46  ;;  %v1605_v52 = vadd.f32 1e-05, %v1581_v51 }
 0x576   : > { %v2306_v50 = vpop.eup %2305  ;;  %v1575_v63 = vpop.xlane.xlu1 %1574 }
 0x577   : > { %v1632_v47 = vmul.f32 %v2306_v50, %v3039_v34  ;;  %2315 = vrsqrt.f32 %v1605_v52  ;;  %v1602_v55 = vadd.f32 1e-05, %v1575_v63 }
 0x578   : > { %v2308_v22 = vpop.eup %2307  ;;  %v1577_v62 = vpop.xlane.xlu0 %1576 }
 0x579   : > { %v1655_v24 = vmul.f32 %v3154_v56, %v1632_v47  ;;  %v1633_v0 = vmul.f32 %v2308_v22, %v3045_v36  ;;  %2317 = vrsqrt.f32 %v1602_v55  ;;  %v1603_v1 = vadd.f32 1e-05, %v1577_v62 }
 0x57a   : > { %v2310_v18 = vpop.eup %2309  ;;  %v1587_v2 = vpop.xlane.xlu1 %1586 }
 0x57b   : > { %v1678_v34 = vadd.f32 %v3162_v60, %v1655_v24  ;;  %v1656_v23 = vmul.f32 %v3154_v56, %v1633_v0  ;;  %v1630_v3 = vmul.f32 %v2310_v18, %v3051_v8  ;;  %2319 = vrsqrt.f32 %v1603_v1 }
 0x57c   : > { %v2312_v4 = vpop.eup %2311  ;;  %v1608_v7 = vadd.f32 1e-05, %v1587_v2  ;;  %v1589_v5 = vpop.xlane.xlu0 %1588 }
 0x57d   : > { %1694 = vst [vmem:[#allocation10 + $0x10] sm:$0xff] %v1678_v34  ;;  %1711 = vst [vmem:[#allocation2 + $0x10] sm:$0xff] %v1678_v34  ;;  %v1679_v6 = vadd.f32 %v3162_v60, %v1656_v23  ;;  %v1653_v36 = vmul.f32 %v3154_v56, %v1630_v3  ;;  %v1631_v45 = vmul.f32 %v2312_v4, %v3058_v20  ;;  %v1609_v9 = vadd.f32 1e-05, %v1589_v5 }
 0x57e   : > { %2321 = vrsqrt.f32 %v1608_v7  ;;  %v1583_v12 = vpop.xlane.xlu1 %1582 }
 0x57f   : > { %v2314_v43 = vpop.eup %2313  ;;  %1695 = vst [vmem:[#allocation10 + $0x18] sm:$0xff] %v1679_v6  ;;  %1712 = vst [vmem:[#allocation2 + $0x18] sm:$0xff] %v1679_v6  ;;  %v1676_v8 = vadd.f32 %v3162_v60, %v1653_v36  ;;  %v1654_v49 = vmul.f32 %v3154_v56, %v1631_v45  ;;  %2323 = vrsqrt.f32 %v1609_v9  ;;  %v1606_v26 = vadd.f32 1e-05, %v1583_v12 }
 0x580   : > { %v1636_v48 = vmul.f32 %v2314_v43, %v3066_v57  ;;  %v1585_v59 = vpop.xlane.xlu0 %1584 }
 0x581   : > { %v2316_v40 = vpop.eup %2315  ;;  %1692 = vst [vmem:[#allocation10] sm:$0xff] %v1676_v8  ;;  %1709 = vst [vmem:[#allocation2] sm:$0xff] %v1676_v8  ;;  %v1677_v20 = vadd.f32 %v3162_v60, %v1654_v49  ;;  %2325 = vrsqrt.f32 %v1606_v26  ;;  %v1607_v30 = vadd.f32 1e-05, %v1585_v59 }
 0x582   : > { %v1659_v15 = vmul.f32 %v3154_v56, %v1636_v48  ;;  %v1637_v31 = vmul.f32 %v2316_v40, %v3073_v42 }
 0x583   : > { %v2318_v35 = vpop.eup %2317  ;;  %1693 = vst [vmem:[#allocation10 + $0x8] sm:$0xff] %v1677_v20  ;;  %1710 = vst [vmem:[#allocation2 + $0x8] sm:$0xff] %v1677_v20  ;;  %2327 = vrsqrt.f32 %v1607_v30  ;;  %v1591_v25 = vpop.xlane.xlu1 %1590 }
 0x584   : > { %v1682_v61 = vadd.f32 %v3162_v60, %v1659_v15  ;;  %v1660_v57 = vmul.f32 %v3154_v56, %v1637_v31  ;;  %v1634_v10 = vmul.f32 %v2318_v35, %v3079_v13  ;;  %v1610_v21 = vadd.f32 1e-05, %v1591_v25 }
 0x585   : > { %v2320_v37 = vpop.eup %2319  ;;  %v1593_v38 = vpop.xlane.xlu0 %1592 }
 0x586   : > { %1698 = vst [vmem:[#allocation10 + $0x30] sm:$0xff] %v1682_v61  ;;  %1715 = vst [vmem:[#allocation2 + $0x30] sm:$0xff] %v1682_v61  ;;  %v1683_v33 = vadd.f32 %v3162_v60, %v1660_v57  ;;  %v1657_v42 = vmul.f32 %v3154_v56, %v1634_v10  ;;  %v1635_v17 = vmul.f32 %v2320_v37, %v3086_v41  ;;  %2329 = vrsqrt.f32 %v1610_v21 }
 0x587   : > { %v1611_v27 = vadd.f32 1e-05, %v1593_v38  ;;  %v1595_v53 = vpop.xlane.xlu1 %1594 }
 0x588   : > { %v2322_v39 = vpop.eup %2321  ;;  %1699 = vst [vmem:[#allocation10 + $0x38] sm:$0xff] %v1683_v33  ;;  %1716 = vst [vmem:[#allocation2 + $0x38] sm:$0xff] %v1683_v33  ;;  %v1680_v54 = vadd.f32 %v3162_v60, %v1657_v42  ;;  %v1658_v13 = vmul.f32 %v3154_v56, %v1635_v17  ;;  %v1612_v58 = vadd.f32 1e-05, %v1595_v53 }
 0x589   : > { %v2324_v46 = vpop.eup %2323  ;;  %v1640_v51 = vmul.f32 %v2322_v39, %v3093_v16  ;;  %2331 = vrsqrt.f32 %v1611_v27  ;;  %v1597_v52 = vpop.xlane.xlu0 %1596 }
 0x58a   : > { %1696 = vst [vmem:[#allocation10 + $0x20] sm:$0xff] %v1680_v54  ;;  %1713 = vst [vmem:[#allocation2 + $0x20] sm:$0xff] %v1680_v54  ;;  %v1681_v41 = vadd.f32 %v3162_v60, %v1658_v13  ;;  %v1641_v50 = vmul.f32 %v2324_v46, %v3100_v29  ;;  %2333 = vrsqrt.f32 %v1612_v58  ;;  %v1613_v63 = vadd.f32 1e-05, %v1597_v52 }
 0x58b   : > { %v2326_v47 = vpop.eup %2325  ;;  %v1663_v55 = vmul.f32 %v3154_v56, %v1640_v51 }
 0x58c   : > { %1697 = vst [vmem:[#allocation10 + $0x28] sm:$0xff] %v1681_v41  ;;  %1714 = vst [vmem:[#allocation2 + $0x28] sm:$0xff] %v1681_v41  ;;  %v1664_v22 = vmul.f32 %v3154_v56, %v1641_v50  ;;  %v1638_v62 = vmul.f32 %v2326_v47, %v3107_v44  ;;  %2335 = vrsqrt.f32 %v1613_v63 }
 0x58d   : > { %v2328_v16 = vpop.eup %2327  ;;  %v1686_v24 = vadd.f32 %v3162_v60, %v1663_v55 }
 0x58e   : > { %v1687_v0 = vadd.f32 %v3162_v60, %v1664_v22  ;;  %v1661_v1 = vmul.f32 %v3154_v56, %v1638_v62  ;;  %v1639_v29 = vmul.f32 %v2328_v16, %v3114_v32 }
 0x58f   : > { %1702 = vst [vmem:[#allocation10 + $0x50] sm:$0xff] %v1686_v24  ;;  %1719 = vst [vmem:[#allocation2 + $0x50] sm:$0xff] %v1686_v24 }
 0x590   : > { %v2330_v18 = vpop.eup %2329  ;;  %1703 = vst [vmem:[#allocation10 + $0x58] sm:$0xff] %v1687_v0  ;;  %1720 = vst [vmem:[#allocation2 + $0x58] sm:$0xff] %v1687_v0  ;;  %v1684_v2 = vadd.f32 %v3162_v60, %v1661_v1  ;;  %v1662_v34 = vmul.f32 %v3154_v56, %v1639_v29 }
 0x591   : > { %v1642_v44 = vmul.f32 %v2330_v18, %v3122_v14 }
 0x592   : > { %1700 = vst [vmem:[#allocation10 + $0x40] sm:$0xff] %v1684_v2  ;;  %1717 = vst [vmem:[#allocation2 + $0x40] sm:$0xff] %v1684_v2  ;;  %v1685_v23 = vadd.f32 %v3162_v60, %v1662_v34 }
 0x593   : > { %v2332_v3 = vpop.eup %2331  ;;  %v1665_v4 = vmul.f32 %v3154_v56, %v1642_v44 }
 0x594   : > { %v2334_v7 = vpop.eup %2333  ;;  %1701 = vst [vmem:[#allocation10 + $0x48] sm:$0xff] %v1685_v23  ;;  %1718 = vst [vmem:[#allocation2 + $0x48] sm:$0xff] %v1685_v23  ;;  %v1643_v32 = vmul.f32 %v2332_v3, %v3129_v28 }
 0x595   : > { %v1688_v5 = vadd.f32 %v3162_v60, %v1665_v4  ;;  %v1644_v6 = vmul.f32 %v2334_v7, %v3135_v11 }
 0x596   : > { %v2336_v36 = vpop.eup %2335  ;;  %v1666_v14 = vmul.f32 %v3154_v56, %v1643_v32 }
 0x597   : > { %1704 = vst [vmem:[#allocation10 + $0x60] sm:$0xff] %v1688_v5  ;;  %1721 = vst [vmem:[#allocation2 + $0x60] sm:$0xff] %v1688_v5  ;;  %v1667_v45 = vmul.f32 %v3154_v56, %v1644_v6  ;;  %v1645_v9 = vmul.f32 %v2336_v36, %v3142_v19 }
 0x598   : > { %v1689_v12 = vadd.f32 %v3162_v60, %v1666_v14 }
 0x599   : > { %v1690_v28 = vadd.f32 %v3162_v60, %v1667_v45  ;;  %v1668_v43 = vmul.f32 %v3154_v56, %v1645_v9 }
 0x59a   : > { %1705 = vst [vmem:[#allocation10 + $0x68] sm:$0xff] %v1689_v12  ;;  %1722 = vst [vmem:[#allocation2 + $0x68] sm:$0xff] %v1689_v12 }
 0x59b   : > { %1706 = vst [vmem:[#allocation10 + $0x70] sm:$0xff] %v1690_v28  ;;  %1723 = vst [vmem:[#allocation2 + $0x70] sm:$0xff] %v1690_v28  ;;  %v1691_v11 = vadd.f32 %v3162_v60, %v1668_v43 }
 0x59d   : > { %1707 = vst [vmem:[#allocation10 + $0x78] sm:$0xff] %v1691_v11  ;;  %1724 = vst [vmem:[#allocation2 + $0x78] sm:$0xff] %v1691_v11 }
 0x59e   : > { %2410 = shalt.err (!%p2407_p6)
}
 0x59f   : > { %s2411_s23 = scalar_lea.hbm %s3266_s9, 2048 }
 0x5a0   : > { %p2412_p10 = scmp.ne.s32.totalorder %s3266_s9, %s2411_s23  ;;  %p2417_p7 = scmp.lt.u32.totalorder %s2411_s23, %s3266_s9 }
 0x5a2   : > { %p2413_p12 = pnand %p2412_p10, %p3212_p4 }
 0x5a4   : > { %p2414_p0 = pneg %p2413_p12 }
 0x5a6   : > { %p2419_p9 = pnand %p2417_p7, %p2414_p0 }
 0x5a8   : > { %2422 = shalt.err (!%p2419_p9)
}
 0x5a9   : > { %s2493_s1 = smov 128   ;;  %s2494_s26 = smov 8  }
 0x5aa   : > { %2154 = dma.vmem_to_hbm [thread:$0]  (%p3212_p4), %s1735_s13, 2048, %s3266_s9, [#allocation7], %s2493_s1, %s2493_s1, %s2494_s26  }
 0x5ab   : > { %2458 = dma.done.wait (%p3212_p4), [#allocation7], 2048  }
 0x5ac   : > { %2460 = vsyncadd (%p3212_p4), [#allocation7], 4294965248 }
 0x5ad PF: > { %s26_s14 = sadd.s32 1, %s2483_s14   ;;  %s3289_s24 = sld [smem:[#allocation19_spill]] }
 0x5ae   : > { %p23_p11 = scmp.ge.s32.totalorder %s26_s14, 4   ;;  %s3290_s12 = sld [smem:[#allocation17_spill]] }
 0x5af   : > { %s3291_s13 = sld [smem:[#allocation18_spill]]  ;;  %s3292_s30 = smov %s2467_s10 }
 0x5b0   : > { %s3293_s10 = smov %s2471_s11  ;;  %25 = sbr.rel (!%p23_p11) target bundleno = 10 (0xa), region = 174 }
 0x5b3   : > { %s3294_s11 = smov %s3289_s24 }
 0x5b7   :  { %1750 = vsyncpa [#allocation6], 1 }
 0x5b8   :  { %1752 = vsyncpa [#allocation6 + $0x1], 1 }
 0x5b9   :  { %1753 = vsyncpa [#allocation9], 1 }
 0x5ba   :  { %1755 = vsyncpa [#allocation9 + $0x1], 1 }
 0x5bb   :  { %1756 = vsyncpa [#allocation7], 1 }
 0x5bc   :  { %1758 = vsyncpa [#allocation7 + $0x1], 1 }

</bundles_post_ra>
